<compile_context>
chip_gen: v7x
topology: tpu7x:2x2x1
jax: 0.10.0
libtpu: 0.0.40
codegen_flags: <defaults>
</compile_context>

<pallas_src>
import functools

import jax
import jax.numpy as jnp
from jax.experimental import pallas as pl
from jax.experimental.pallas import tpu as pltpu

# ---- config (LSTMConfig) ----
N_HIDDEN = 2          # LSTMConfig.n_hidden
N_LAYER = 1           # LSTMConfig.n_layer (single layer implemented)
BLOCK_SIZE = 16       # LSTMConfig.block_size -> sequence length T
INPUT_SIZE = 32       # LSTMConfig.input_size is None in the source; pick vocab = 32
BATCH = 2


def lstm_fc_kernel(x_ref, wih_ref, whh_ref, b_ref, wfc_ref, bfc_ref,
                   out_ref, hs_ref, *, batch):
    """Whole-batch LSTM recurrence + fused fc projection (time-major rows).

    x_ref   : (T*B, H)  embedded inputs, row t*B + b  (time-major)
    wih_ref : (H, 4H)   fused input weights  (gate order i|f|g|o along last dim)
    whh_ref : (H, 4H)   fused hidden weights
    b_ref   : (1, 4H)   fused bias (b_ih + b_hh)
    wfc_ref : (H, V)    fc weight, transposed
    bfc_ref : (1, V)    fc bias
    out_ref : (T*B, V)  logits, row t*B + b  (time-major; reordered outside)
    hs_ref  : (T*B, H)  VMEM scratch holding every hidden state
    """
    TB, H = hs_ref.shape
    B = batch
    T = TB // B

    # Input projection for every (t, b) in ONE matmul, hoisted off the serial chain.
    xg = (jnp.dot(x_ref[...], wih_ref[...], preferred_element_type=jnp.float32)
          + b_ref[...])                                        # (T*B, 4H)

    whh = whh_ref[...]                                         # (H, 4H)

    h = jnp.zeros((B, H), jnp.float32)
    c = jnp.zeros((B, H), jnp.float32)

    # T is small & static (block_size=16): unroll the recurrence.
    for t in range(T):
        # Single fused matmul per step on the dependency chain (all batch rows).
        gates = xg[t * B:(t + 1) * B, :] + jnp.dot(
            h, whh, preferred_element_type=jnp.float32)        # (B, 4H)

        sig = jax.nn.sigmoid(gates)                            # one EUP push (i, f, o)
        i_g = sig[:, 0:H]
        f_g = sig[:, H:2 * H]
        o_g = sig[:, 3 * H:4 * H]
        g_g = jnp.tanh(gates[:, 2 * H:3 * H])                  # one EUP push

        c = f_g * c + i_g * g_g
        h = o_g * jnp.tanh(c)                                  # one EUP push

        hs_ref[t * B:(t + 1) * B, :] = h                       # stash hidden states

    # Batched fc projection: one matmul + one contiguous (T*B, V) store.
    out_ref[...] = (jnp.dot(hs_ref[...], wfc_ref[...],
                            preferred_element_type=jnp.float32)
                    + bfc_ref[...])


def init_params(key, vocab=INPUT_SIZE, hidden=N_HIDDEN):
    k1, k2, k3, k4, k5, k6, k7 = jax.random.split(key, 7)
    scale = 1.0 / jnp.sqrt(hidden)
    params = {
        "embedding": jax.random.normal(k1, (vocab, hidden), jnp.float32),
        # PyTorch nn.LSTM layout: weight_ih_l0 (4H, H), weight_hh_l0 (4H, H)
        "w_ih": jax.random.uniform(k2, (4 * hidden, hidden), jnp.float32, -scale, scale),
        "w_hh": jax.random.uniform(k3, (4 * hidden, hidden), jnp.float32, -scale, scale),
        "b_ih": jax.random.uniform(k4, (4 * hidden,), jnp.float32, -scale, scale),
        "b_hh": jax.random.uniform(k5, (4 * hidden,), jnp.float32, -scale, scale),
        # nn.Linear(hidden, vocab): weight (V, H), bias (V,)
        "fc_w": jax.random.uniform(k6, (vocab, hidden), jnp.float32, -scale, scale),
        "fc_b": jax.random.uniform(k7, (vocab,), jnp.float32, -scale, scale),
    }
    return params


def lstm_forward(x_idx, params):
    """Mirrors LSTM.forward(x) with targets=None -> returns logits (B*T, V)."""
    V, H = params["embedding"].shape
    B, T = x_idx.shape

    # Embedding gather in time-major row order (row = t*B + b)  -- plain-JAX glue.
    idx_tm = x_idx.T.reshape(-1)                                      # (T*B,)
    x_tm = jnp.take(params["embedding"], idx_tm, axis=0).astype(jnp.float32)  # (T*B, H)

    # Fuse / transpose weights for the kernel (glue).
    wih_f = params["w_ih"].T                                     # (H, 4H)
    whh_f = params["w_hh"].T                                     # (H, 4H)
    b_f = (params["b_ih"] + params["b_hh"]).reshape(1, 4 * H)    # (1, 4H)
    wfc_t = params["fc_w"].T                                     # (H, V)
    bfc = params["fc_b"].reshape(1, V)                           # (1, V)

    out_tm = pl.pallas_call(
        functools.partial(lstm_fc_kernel, batch=B),
        out_shape=jax.ShapeDtypeStruct((T * B, V), jnp.float32),
        in_specs=[pl.BlockSpec(memory_space=pltpu.MemorySpace.VMEM)] * 6,
        out_specs=pl.BlockSpec(memory_space=pltpu.MemorySpace.VMEM),
        scratch_shapes=[pltpu.VMEM((T * B, H), jnp.float32)],
    )(x_tm, wih_f, whh_f, b_f, wfc_t, bfc)

    # Reorder time-major rows (t*B + b) -> batch-major rows (b*T + t) so the
    # result matches PyTorch's out.contiguous().view(-1, n_hidden) @ fc.
    # Tiny (T*B, V) = 4 KiB reorder; pure layout glue.
    out = out_tm.reshape(T, B, V).transpose(1, 0, 2).reshape(B * T, V)
    return out
    # TODO(synk): cross-entropy loss branch (targets is not None) not implemented.


def lstm_forward_ref(x_idx, params):
    """Pure-JAX reference for correctness checking."""
    V, H = params["embedding"].shape
    B, T = x_idx.shape
    emb = jnp.take(params["embedding"], x_idx, axis=0).astype(jnp.float32)

    def step(carry, x_t):
        h, c = carry
        gates = (x_t @ params["w_ih"].T + params["b_ih"]
                 + h @ params["w_hh"].T + params["b_hh"])
        i = jax.nn.sigmoid(gates[:, 0:H])
        f = jax.nn.sigmoid(gates[:, H:2 * H])
        g = jnp.tanh(gates[:, 2 * H:3 * H])
        o = jax.nn.sigmoid(gates[:, 3 * H:4 * H])
        c = f * c + i * g
        h = o * jnp.tanh(c)
        return (h, c), h

    h0 = jnp.zeros((B, H), jnp.float32)
    c0 = jnp.zeros((B, H), jnp.float32)
    _, hs = jax.lax.scan(step, (h0, c0), jnp.swapaxes(emb, 0, 1))  # (T, B, H)
    hs = jnp.swapaxes(hs, 0, 1).reshape(-1, H)                     # (B*T, H)
    return hs @ params["fc_w"].T + params["fc_b"]


if __name__ == "__main__":
    key = jax.random.PRNGKey(0)
    pkey, xkey = jax.random.split(key)

    params = init_params(pkey)
    x = jax.random.randint(xkey, (BATCH, BLOCK_SIZE), 0, INPUT_SIZE, dtype=jnp.int32)

    logits = lstm_forward(x, params)
    logits = jax.block_until_ready(logits)

    ref = lstm_forward_ref(x, params)
    assert logits.shape == (BATCH * BLOCK_SIZE, INPUT_SIZE), logits.shape
    assert jnp.allclose(logits, ref, atol=1e-4, rtol=1e-4), (
        float(jnp.max(jnp.abs(logits - ref))))

    print("KERNEL_OK")
</pallas_src>

<mosaic_0001>
module attributes {stable_mosaic.version = 11 : i64} {
  func.func @lstm_fc_kernel(%arg0: memref<32x2xf32, #tpu.memory_space<vmem>>, %arg1: memref<2x8xf32, #tpu.memory_space<vmem>>, %arg2: memref<2x8xf32, #tpu.memory_space<vmem>>, %arg3: memref<1x8xf32, #tpu.memory_space<vmem>>, %arg4: memref<2x32xf32, #tpu.memory_space<vmem>>, %arg5: memref<1x32xf32, #tpu.memory_space<vmem>>, %arg6: memref<32x32xf32, #tpu.memory_space<vmem>>, %arg7: memref<32x2xf32, #tpu.memory_space<vmem>>) attributes {dimension_semantics = [], scalar_prefetch = 0 : i64, scratch_operands = 1 : i64, tpu.core_type = #tpu.core_type<tc>} {
    %c0 = arith.constant 0 : index
    %c0_0 = arith.constant 0 : index
    %0 = vector.load %arg0[%c0, %c0_0] : memref<32x2xf32, #tpu.memory_space<vmem>>, vector<32x2xf32>
    %c0_1 = arith.constant 0 : index
    %c0_2 = arith.constant 0 : index
    %1 = vector.load %arg1[%c0_1, %c0_2] : memref<2x8xf32, #tpu.memory_space<vmem>>, vector<2x8xf32>
    %cst = arith.constant dense<0.000000e+00> : vector<32x8xf32>
    %2 = tpu.matmul %0, %1, %cst {dimension_numbers = #tpu.dot_dimension_numbers<[1], [0], [0], [1], [0, 0, 1, 1], [], []>} : vector<32x2xf32>, vector<2x8xf32>, vector<32x8xf32> -> vector<32x8xf32>
    %c0_3 = arith.constant 0 : index
    %c0_4 = arith.constant 0 : index
    %3 = vector.load %arg3[%c0_3, %c0_4] : memref<1x8xf32, #tpu.memory_space<vmem>>, vector<1x8xf32>
    %4 = vector.broadcast %3 : vector<1x8xf32> to vector<32x8xf32>
    %5 = arith.addf %2, %4 : vector<32x8xf32>
    %c0_5 = arith.constant 0 : index
    %c0_6 = arith.constant 0 : index
    %6 = vector.load %arg2[%c0_5, %c0_6] : memref<2x8xf32, #tpu.memory_space<vmem>>, vector<2x8xf32>
    %cst_7 = arith.constant 0.000000e+00 : f32
    %7 = vector.broadcast %cst_7 : f32 to vector<2x2xf32>
    %cst_8 = arith.constant 0.000000e+00 : f32
    %8 = vector.broadcast %cst_8 : f32 to vector<2x2xf32>
    %9 = vector.extract_strided_slice %5 {offsets = [0, 0], sizes = [2, 8], strides = [1, 1]} : vector<32x8xf32> to vector<2x8xf32>
    %cst_9 = arith.constant dense<0.000000e+00> : vector<2x8xf32>
    %10 = tpu.matmul %7, %6, %cst_9 {dimension_numbers = #tpu.dot_dimension_numbers<[1], [0], [0], [1], [0, 0, 1, 1], [], []>} : vector<2x2xf32>, vector<2x8xf32>, vector<2x8xf32> -> vector<2x8xf32>
    %11 = arith.addf %9, %10 : vector<2x8xf32>
    %12 = arith.negf %11 : vector<2x8xf32>
    %13 = math.exp %12 : vector<2x8xf32>
    %cst_10 = arith.constant 1.000000e+00 : f32
    %14 = vector.broadcast %cst_10 : f32 to vector<2x8xf32>
    %15 = arith.addf %14, %13 : vector<2x8xf32>
    %16 = arith.divf %14, %15 : vector<2x8xf32>
    %17 = vector.extract_strided_slice %16 {offsets = [0, 0], sizes = [2, 2], strides = [1, 1]} : vector<2x8xf32> to vector<2x2xf32>
    %18 = vector.extract_strided_slice %16 {offsets = [0, 2], sizes = [2, 2], strides = [1, 1]} : vector<2x8xf32> to vector<2x2xf32>
    %19 = vector.extract_strided_slice %16 {offsets = [0, 6], sizes = [2, 2], strides = [1, 1]} : vector<2x8xf32> to vector<2x2xf32>
    %20 = vector.extract_strided_slice %11 {offsets = [0, 4], sizes = [2, 2], strides = [1, 1]} : vector<2x8xf32> to vector<2x2xf32>
    %21 = math.tanh %20 : vector<2x2xf32>
    %22 = arith.mulf %18, %8 : vector<2x2xf32>
    %23 = arith.mulf %17, %21 : vector<2x2xf32>
    %24 = arith.addf %22, %23 : vector<2x2xf32>
    %25 = math.tanh %24 : vector<2x2xf32>
    %26 = arith.mulf %19, %25 : vector<2x2xf32>
    %c0_11 = arith.constant 0 : index
    %c0_12 = arith.constant 0 : index
    %27 = vector.load %arg7[%c0_11, %c0_12] : memref<32x2xf32, #tpu.memory_space<vmem>>, vector<2x2xf32>
    tpu.vector_store %arg7[%c0_11, %c0_12], %26 {strides = array<i32>} : memref<32x2xf32, #tpu.memory_space<vmem>>, vector<2x2xf32>,
    %28 = vector.extract_strided_slice %5 {offsets = [2, 0], sizes = [2, 8], strides = [1, 1]} : vector<32x8xf32> to vector<2x8xf32>
    %cst_13 = arith.constant dense<0.000000e+00> : vector<2x8xf32>
    %29 = tpu.matmul %26, %6, %cst_13 {dimension_numbers = #tpu.dot_dimension_numbers<[1], [0], [0], [1], [0, 0, 1, 1], [], []>} : vector<2x2xf32>, vector<2x8xf32>, vector<2x8xf32> -> vector<2x8xf32>
    %30 = arith.addf %28, %29 : vector<2x8xf32>
    %31 = arith.negf %30 : vector<2x8xf32>
    %32 = math.exp %31 : vector<2x8xf32>
    %cst_14 = arith.constant 1.000000e+00 : f32
    %33 = vector.broadcast %cst_14 : f32 to vector<2x8xf32>
    %34 = arith.addf %33, %32 : vector<2x8xf32>
    %35 = arith.divf %33, %34 : vector<2x8xf32>
    %36 = vector.extract_strided_slice %35 {offsets = [0, 0], sizes = [2, 2], strides = [1, 1]} : vector<2x8xf32> to vector<2x2xf32>
    %37 = vector.extract_strided_slice %35 {offsets = [0, 2], sizes = [2, 2], strides = [1, 1]} : vector<2x8xf32> to vector<2x2xf32>
    %38 = vector.extract_strided_slice %35 {offsets = [0, 6], sizes = [2, 2], strides = [1, 1]} : vector<2x8xf32> to vector<2x2xf32>
    %39 = vector.extract_strided_slice %30 {offsets = [0, 4], sizes = [2, 2], strides = [1, 1]} : vector<2x8xf32> to vector<2x2xf32>
    %40 = math.tanh %39 : vector<2x2xf32>
    %41 = arith.mulf %37, %24 : vector<2x2xf32>
    %42 = arith.mulf %36, %40 : vector<2x2xf32>
    %43 = arith.addf %41, %42 : vector<2x2xf32>
    %44 = math.tanh %43 : vector<2x2xf32>
    %45 = arith.mulf %38, %44 : vector<2x2xf32>
    %c2 = arith.constant 2 : index
    %c0_15 = arith.constant 0 : index
    %46 = vector.load %arg7[%c2, %c0_15] : memref<32x2xf32, #tpu.memory_space<vmem>>, vector<2x2xf32>
    tpu.vector_store %arg7[%c2, %c0_15], %45 {strides = array<i32>} : memref<32x2xf32, #tpu.memory_space<vmem>>, vector<2x2xf32>,
    %47 = vector.extract_strided_slice %5 {offsets = [4, 0], sizes = [2, 8], strides = [1, 1]} : vector<32x8xf32> to vector<2x8xf32>
    %cst_16 = arith.constant dense<0.000000e+00> : vector<2x8xf32>
    %48 = tpu.matmul %45, %6, %cst_16 {dimension_numbers = #tpu.dot_dimension_numbers<[1], [0], [0], [1], [0, 0, 1, 1], [], []>} : vector<2x2xf32>, vector<2x8xf32>, vector<2x8xf32> -> vector<2x8xf32>
    %49 = arith.addf %47, %48 : vector<2x8xf32>
    %50 = arith.negf %49 : vector<2x8xf32>
    %51 = math.exp %50 : vector<2x8xf32>
    %cst_17 = arith.constant 1.000000e+00 : f32
    %52 = vector.broadcast %cst_17 : f32 to vector<2x8xf32>
    %53 = arith.addf %52, %51 : vector<2x8xf32>
    %54 = arith.divf %52, %53 : vector<2x8xf32>
    %55 = vector.extract_strided_slice %54 {offsets = [0, 0], sizes = [2, 2], strides = [1, 1]} : vector<2x8xf32> to vector<2x2xf32>
    %56 = vector.extract_strided_slice %54 {offsets = [0, 2], sizes = [2, 2], strides = [1, 1]} : vector<2x8xf32> to vector<2x2xf32>
    %57 = vector.extract_strided_slice %54 {offsets = [0, 6], sizes = [2, 2], strides = [1, 1]} : vector<2x8xf32> to vector<2x2xf32>
    %58 = vector.extract_strided_slice %49 {offsets = [0, 4], sizes = [2, 2], strides = [1, 1]} : vector<2x8xf32> to vector<2x2xf32>
    %59 = math.tanh %58 : vector<2x2xf32>
    %60 = arith.mulf %56, %43 : vector<2x2xf32>
    %61 = arith.mulf %55, %59 : vector<2x2xf32>
    %62 = arith.addf %60, %61 : vector<2x2xf32>
    %63 = math.tanh %62 : vector<2x2xf32>
    %64 = arith.mulf %57, %63 : vector<2x2xf32>
    %c4 = arith.constant 4 : index
    %c0_18 = arith.constant 0 : index
    %65 = vector.load %arg7[%c4, %c0_18] : memref<32x2xf32, #tpu.memory_space<vmem>>, vector<2x2xf32>
    tpu.vector_store %arg7[%c4, %c0_18], %64 {strides = array<i32>} : memref<32x2xf32, #tpu.memory_space<vmem>>, vector<2x2xf32>,
    %66 = vector.extract_strided_slice %5 {offsets = [6, 0], sizes = [2, 8], strides = [1, 1]} : vector<32x8xf32> to vector<2x8xf32>
    %cst_19 = arith.constant dense<0.000000e+00> : vector<2x8xf32>
    %67 = tpu.matmul %64, %6, %cst_19 {dimension_numbers = #tpu.dot_dimension_numbers<[1], [0], [0], [1], [0, 0, 1, 1], [], []>} : vector<2x2xf32>, vector<2x8xf32>, vector<2x8xf32> -> vector<2x8xf32>
    %68 = arith.addf %66, %67 : vector<2x8xf32>
    %69 = arith.negf %68 : vector<2x8xf32>
    %70 = math.exp %69 : vector<2x8xf32>
    %cst_20 = arith.constant 1.000000e+00 : f32
    %71 = vector.broadcast %cst_20 : f32 to vector<2x8xf32>
    %72 = arith.addf %71, %70 : vector<2x8xf32>
    %73 = arith.divf %71, %72 : vector<2x8xf32>
    %74 = vector.extract_strided_slice %73 {offsets = [0, 0], sizes = [2, 2], strides = [1, 1]} : vector<2x8xf32> to vector<2x2xf32>
    %75 = vector.extract_strided_slice %73 {offsets = [0, 2], sizes = [2, 2], strides = [1, 1]} : vector<2x8xf32> to vector<2x2xf32>
    %76 = vector.extract_strided_slice %73 {offsets = [0, 6], sizes = [2, 2], strides = [1, 1]} : vector<2x8xf32> to vector<2x2xf32>
    %77 = vector.extract_strided_slice %68 {offsets = [0, 4], sizes = [2, 2], strides = [1, 1]} : vector<2x8xf32> to vector<2x2xf32>
    %78 = math.tanh %77 : vector<2x2xf32>
    %79 = arith.mulf %75, %62 : vector<2x2xf32>
    %80 = arith.mulf %74, %78 : vector<2x2xf32>
    %81 = arith.addf %79, %80 : vector<2x2xf32>
    %82 = math.tanh %81 : vector<2x2xf32>
    %83 = arith.mulf %76, %82 : vector<2x2xf32>
    %c6 = arith.constant 6 : index
    %c0_21 = arith.constant 0 : index
    %84 = vector.load %arg7[%c6, %c0_21] : memref<32x2xf32, #tpu.memory_space<vmem>>, vector<2x2xf32>
    tpu.vector_store %arg7[%c6, %c0_21], %83 {strides = array<i32>} : memref<32x2xf32, #tpu.memory_space<vmem>>, vector<2x2xf32>,
    %85 = vector.extract_strided_slice %5 {offsets = [8, 0], sizes = [2, 8], strides = [1, 1]} : vector<32x8xf32> to vector<2x8xf32>
    %cst_22 = arith.constant dense<0.000000e+00> : vector<2x8xf32>
    %86 = tpu.matmul %83, %6, %cst_22 {dimension_numbers = #tpu.dot_dimension_numbers<[1], [0], [0], [1], [0, 0, 1, 1], [], []>} : vector<2x2xf32>, vector<2x8xf32>, vector<2x8xf32> -> vector<2x8xf32>
    %87 = arith.addf %85, %86 : vector<2x8xf32>
    %88 = arith.negf %87 : vector<2x8xf32>
    %89 = math.exp %88 : vector<2x8xf32>
    %cst_23 = arith.constant 1.000000e+00 : f32
    %90 = vector.broadcast %cst_23 : f32 to vector<2x8xf32>
    %91 = arith.addf %90, %89 : vector<2x8xf32>
    %92 = arith.divf %90, %91 : vector<2x8xf32>
    %93 = vector.extract_strided_slice %92 {offsets = [0, 0], sizes = [2, 2], strides = [1, 1]} : vector<2x8xf32> to vector<2x2xf32>
    %94 = vector.extract_strided_slice %92 {offsets = [0, 2], sizes = [2, 2], strides = [1, 1]} : vector<2x8xf32> to vector<2x2xf32>
    %95 = vector.extract_strided_slice %92 {offsets = [0, 6], sizes = [2, 2], strides = [1, 1]} : vector<2x8xf32> to vector<2x2xf32>
    %96 = vector.extract_strided_slice %87 {offsets = [0, 4], sizes = [2, 2], strides = [1, 1]} : vector<2x8xf32> to vector<2x2xf32>
    %97 = math.tanh %96 : vector<2x2xf32>
    %98 = arith.mulf %94, %81 : vector<2x2xf32>
    %99 = arith.mulf %93, %97 : vector<2x2xf32>
    %100 = arith.addf %98, %99 : vector<2x2xf32>
    %101 = math.tanh %100 : vector<2x2xf32>
    %102 = arith.mulf %95, %101 : vector<2x2xf32>
    %c8 = arith.constant 8 : index
    %c0_24 = arith.constant 0 : index
    %103 = vector.load %arg7[%c8, %c0_24] : memref<32x2xf32, #tpu.memory_space<vmem>>, vector<2x2xf32>
    tpu.vector_store %arg7[%c8, %c0_24], %102 {strides = array<i32>} : memref<32x2xf32, #tpu.memory_space<vmem>>, vector<2x2xf32>,
    %104 = vector.extract_strided_slice %5 {offsets = [10, 0], sizes = [2, 8], strides = [1, 1]} : vector<32x8xf32> to vector<2x8xf32>
    %cst_25 = arith.constant dense<0.000000e+00> : vector<2x8xf32>
    %105 = tpu.matmul %102, %6, %cst_25 {dimension_numbers = #tpu.dot_dimension_numbers<[1], [0], [0], [1], [0, 0, 1, 1], [], []>} : vector<2x2xf32>, vector<2x8xf32>, vector<2x8xf32> -> vector<2x8xf32>
    %106 = arith.addf %104, %105 : vector<2x8xf32>
    %107 = arith.negf %106 : vector<2x8xf32>
    %108 = math.exp %107 : vector<2x8xf32>
    %cst_26 = arith.constant 1.000000e+00 : f32
    %109 = vector.broadcast %cst_26 : f32 to vector<2x8xf32>
    %110 = arith.addf %109, %108 : vector<2x8xf32>
    %111 = arith.divf %109, %110 : vector<2x8xf32>
    %112 = vector.extract_strided_slice %111 {offsets = [0, 0], sizes = [2, 2], strides = [1, 1]} : vector<2x8xf32> to vector<2x2xf32>
    %113 = vector.extract_strided_slice %111 {offsets = [0, 2], sizes = [2, 2], strides = [1, 1]} : vector<2x8xf32> to vector<2x2xf32>
    %114 = vector.extract_strided_slice %111 {offsets = [0, 6], sizes = [2, 2], strides = [1, 1]} : vector<2x8xf32> to vector<2x2xf32>
    %115 = vector.extract_strided_slice %106 {offsets = [0, 4], sizes = [2, 2], strides = [1, 1]} : vector<2x8xf32> to vector<2x2xf32>
    %116 = math.tanh %115 : vector<2x2xf32>
    %117 = arith.mulf %113, %100 : vector<2x2xf32>
    %118 = arith.mulf %112, %116 : vector<2x2xf32>
    %119 = arith.addf %117, %118 : vector<2x2xf32>
    %120 = math.tanh %119 : vector<2x2xf32>
    %121 = arith.mulf %114, %120 : vector<2x2xf32>
    %c10 = arith.constant 10 : index
    %c0_27 = arith.constant 0 : index
    %122 = vector.load %arg7[%c10, %c0_27] : memref<32x2xf32, #tpu.memory_space<vmem>>, vector<2x2xf32>
    tpu.vector_store %arg7[%c10, %c0_27], %121 {strides = array<i32>} : memref<32x2xf32, #tpu.memory_space<vmem>>, vector<2x2xf32>,
    %123 = vector.extract_strided_slice %5 {offsets = [12, 0], sizes = [2, 8], strides = [1, 1]} : vector<32x8xf32> to vector<2x8xf32>
    %cst_28 = arith.constant dense<0.000000e+00> : vector<2x8xf32>
    %124 = tpu.matmul %121, %6, %cst_28 {dimension_numbers = #tpu.dot_dimension_numbers<[1], [0], [0], [1], [0, 0, 1, 1], [], []>} : vector<2x2xf32>, vector<2x8xf32>, vector<2x8xf32> -> vector<2x8xf32>
    %125 = arith.addf %123, %124 : vector<2x8xf32>
    %126 = arith.negf %125 : vector<2x8xf32>
    %127 = math.exp %126 : vector<2x8xf32>
    %cst_29 = arith.constant 1.000000e+00 : f32
    %128 = vector.broadcast %cst_29 : f32 to vector<2x8xf32>
    %129 = arith.addf %128, %127 : vector<2x8xf32>
    %130 = arith.divf %128, %129 : vector<2x8xf32>
    %131 = vector.extract_strided_slice %130 {offsets = [0, 0], sizes = [2, 2], strides = [1, 1]} : vector<2x8xf32> to vector<2x2xf32>
    %132 = vector.extract_strided_slice %130 {offsets = [0, 2], sizes = [2, 2], strides = [1, 1]} : vector<2x8xf32> to vector<2x2xf32>
    %133 = vector.extract_strided_slice %130 {offsets = [0, 6], sizes = [2, 2], strides = [1, 1]} : vector<2x8xf32> to vector<2x2xf32>
    %134 = vector.extract_strided_slice %125 {offsets = [0, 4], sizes = [2, 2], strides = [1, 1]} : vector<2x8xf32> to vector<2x2xf32>
    %135 = math.tanh %134 : vector<2x2xf32>
    %136 = arith.mulf %132, %119 : vector<2x2xf32>
    %137 = arith.mulf %131, %135 : vector<2x2xf32>
    %138 = arith.addf %136, %137 : vector<2x2xf32>
    %139 = math.tanh %138 : vector<2x2xf32>
    %140 = arith.mulf %133, %139 : vector<2x2xf32>
    %c12 = arith.constant 12 : index
    %c0_30 = arith.constant 0 : index
    %141 = vector.load %arg7[%c12, %c0_30] : memref<32x2xf32, #tpu.memory_space<vmem>>, vector<2x2xf32>
    tpu.vector_store %arg7[%c12, %c0_30], %140 {strides = array<i32>} : memref<32x2xf32, #tpu.memory_space<vmem>>, vector<2x2xf32>,
    %142 = vector.extract_strided_slice %5 {offsets = [14, 0], sizes = [2, 8], strides = [1, 1]} : vector<32x8xf32> to vector<2x8xf32>
    %cst_31 = arith.constant dense<0.000000e+00> : vector<2x8xf32>
    %143 = tpu.matmul %140, %6, %cst_31 {dimension_numbers = #tpu.dot_dimension_numbers<[1], [0], [0], [1], [0, 0, 1, 1], [], []>} : vector<2x2xf32>, vector<2x8xf32>, vector<2x8xf32> -> vector<2x8xf32>
    %144 = arith.addf %142, %143 : vector<2x8xf32>
    %145 = arith.negf %144 : vector<2x8xf32>
    %146 = math.exp %145 : vector<2x8xf32>
    %cst_32 = arith.constant 1.000000e+00 : f32
    %147 = vector.broadcast %cst_32 : f32 to vector<2x8xf32>
    %148 = arith.addf %147, %146 : vector<2x8xf32>
    %149 = arith.divf %147, %148 : vector<2x8xf32>
    %150 = vector.extract_strided_slice %149 {offsets = [0, 0], sizes = [2, 2], strides = [1, 1]} : vector<2x8xf32> to vector<2x2xf32>
    %151 = vector.extract_strided_slice %149 {offsets = [0, 2], sizes = [2, 2], strides = [1, 1]} : vector<2x8xf32> to vector<2x2xf32>
    %152 = vector.extract_strided_slice %149 {offsets = [0, 6], sizes = [2, 2], strides = [1, 1]} : vector<2x8xf32> to vector<2x2xf32>
    %153 = vector.extract_strided_slice %144 {offsets = [0, 4], sizes = [2, 2], strides = [1, 1]} : vector<2x8xf32> to vector<2x2xf32>
    %154 = math.tanh %153 : vector<2x2xf32>
    %155 = arith.mulf %151, %138 : vector<2x2xf32>
    %156 = arith.mulf %150, %154 : vector<2x2xf32>
    %157 = arith.addf %155, %156 : vector<2x2xf32>
    %158 = math.tanh %157 : vector<2x2xf32>
    %159 = arith.mulf %152, %158 : vector<2x2xf32>
    %c14 = arith.constant 14 : index
    %c0_33 = arith.constant 0 : index
    %160 = vector.load %arg7[%c14, %c0_33] : memref<32x2xf32, #tpu.memory_space<vmem>>, vector<2x2xf32>
    tpu.vector_store %arg7[%c14, %c0_33], %159 {strides = array<i32>} : memref<32x2xf32, #tpu.memory_space<vmem>>, vector<2x2xf32>,
    %161 = vector.extract_strided_slice %5 {offsets = [16, 0], sizes = [2, 8], strides = [1, 1]} : vector<32x8xf32> to vector<2x8xf32>
    %cst_34 = arith.constant dense<0.000000e+00> : vector<2x8xf32>
    %162 = tpu.matmul %159, %6, %cst_34 {dimension_numbers = #tpu.dot_dimension_numbers<[1], [0], [0], [1], [0, 0, 1, 1], [], []>} : vector<2x2xf32>, vector<2x8xf32>, vector<2x8xf32> -> vector<2x8xf32>
    %163 = arith.addf %161, %162 : vector<2x8xf32>
    %164 = arith.negf %163 : vector<2x8xf32>
    %165 = math.exp %164 : vector<2x8xf32>
    %cst_35 = arith.constant 1.000000e+00 : f32
    %166 = vector.broadcast %cst_35 : f32 to vector<2x8xf32>
    %167 = arith.addf %166, %165 : vector<2x8xf32>
    %168 = arith.divf %166, %167 : vector<2x8xf32>
    %169 = vector.extract_strided_slice %168 {offsets = [0, 0], sizes = [2, 2], strides = [1, 1]} : vector<2x8xf32> to vector<2x2xf32>
    %170 = vector.extract_strided_slice %168 {offsets = [0, 2], sizes = [2, 2], strides = [1, 1]} : vector<2x8xf32> to vector<2x2xf32>
    %171 = vector.extract_strided_slice %168 {offsets = [0, 6], sizes = [2, 2], strides = [1, 1]} : vector<2x8xf32> to vector<2x2xf32>
    %172 = vector.extract_strided_slice %163 {offsets = [0, 4], sizes = [2, 2], strides = [1, 1]} : vector<2x8xf32> to vector<2x2xf32>
    %173 = math.tanh %172 : vector<2x2xf32>
    %174 = arith.mulf %170, %157 : vector<2x2xf32>
    %175 = arith.mulf %169, %173 : vector<2x2xf32>
    %176 = arith.addf %174, %175 : vector<2x2xf32>
    %177 = math.tanh %176 : vector<2x2xf32>
    %178 = arith.mulf %171, %177 : vector<2x2xf32>
    %c16 = arith.constant 16 : index
    %c0_36 = arith.constant 0 : index
    %179 = vector.load %arg7[%c16, %c0_36] : memref<32x2xf32, #tpu.memory_space<vmem>>, vector<2x2xf32>
    tpu.vector_store %arg7[%c16, %c0_36], %178 {strides = array<i32>} : memref<32x2xf32, #tpu.memory_space<vmem>>, vector<2x2xf32>,
    %180 = vector.extract_strided_slice %5 {offsets = [18, 0], sizes = [2, 8], strides = [1, 1]} : vector<32x8xf32> to vector<2x8xf32>
    %cst_37 = arith.constant dense<0.000000e+00> : vector<2x8xf32>
    %181 = tpu.matmul %178, %6, %cst_37 {dimension_numbers = #tpu.dot_dimension_numbers<[1], [0], [0], [1], [0, 0, 1, 1], [], []>} : vector<2x2xf32>, vector<2x8xf32>, vector<2x8xf32> -> vector<2x8xf32>
    %182 = arith.addf %180, %181 : vector<2x8xf32>
    %183 = arith.negf %182 : vector<2x8xf32>
    %184 = math.exp %183 : vector<2x8xf32>
    %cst_38 = arith.constant 1.000000e+00 : f32
    %185 = vector.broadcast %cst_38 : f32 to vector<2x8xf32>
    %186 = arith.addf %185, %184 : vector<2x8xf32>
    %187 = arith.divf %185, %186 : vector<2x8xf32>
    %188 = vector.extract_strided_slice %187 {offsets = [0, 0], sizes = [2, 2], strides = [1, 1]} : vector<2x8xf32> to vector<2x2xf32>
    %189 = vector.extract_strided_slice %187 {offsets = [0, 2], sizes = [2, 2], strides = [1, 1]} : vector<2x8xf32> to vector<2x2xf32>
    %190 = vector.extract_strided_slice %187 {offsets = [0, 6], sizes = [2, 2], strides = [1, 1]} : vector<2x8xf32> to vector<2x2xf32>
    %191 = vector.extract_strided_slice %182 {offsets = [0, 4], sizes = [2, 2], strides = [1, 1]} : vector<2x8xf32> to vector<2x2xf32>
    %192 = math.tanh %191 : vector<2x2xf32>
    %193 = arith.mulf %189, %176 : vector<2x2xf32>
    %194 = arith.mulf %188, %192 : vector<2x2xf32>
    %195 = arith.addf %193, %194 : vector<2x2xf32>
    %196 = math.tanh %195 : vector<2x2xf32>
    %197 = arith.mulf %190, %196 : vector<2x2xf32>
    %c18 = arith.constant 18 : index
    %c0_39 = arith.constant 0 : index
    %198 = vector.load %arg7[%c18, %c0_39] : memref<32x2xf32, #tpu.memory_space<vmem>>, vector<2x2xf32>
    tpu.vector_store %arg7[%c18, %c0_39], %197 {strides = array<i32>} : memref<32x2xf32, #tpu.memory_space<vmem>>, vector<2x2xf32>,
    %199 = vector.extract_strided_slice %5 {offsets = [20, 0], sizes = [2, 8], strides = [1, 1]} : vector<32x8xf32> to vector<2x8xf32>
    %cst_40 = arith.constant dense<0.000000e+00> : vector<2x8xf32>
    %200 = tpu.matmul %197, %6, %cst_40 {dimension_numbers = #tpu.dot_dimension_numbers<[1], [0], [0], [1], [0, 0, 1, 1], [], []>} : vector<2x2xf32>, vector<2x8xf32>, vector<2x8xf32> -> vector<2x8xf32>
    %201 = arith.addf %199, %200 : vector<2x8xf32>
    %202 = arith.negf %201 : vector<2x8xf32>
    %203 = math.exp %202 : vector<2x8xf32>
    %cst_41 = arith.constant 1.000000e+00 : f32
    %204 = vector.broadcast %cst_41 : f32 to vector<2x8xf32>
    %205 = arith.addf %204, %203 : vector<2x8xf32>
    %206 = arith.divf %204, %205 : vector<2x8xf32>
    %207 = vector.extract_strided_slice %206 {offsets = [0, 0], sizes = [2, 2], strides = [1, 1]} : vector<2x8xf32> to vector<2x2xf32>
    %208 = vector.extract_strided_slice %206 {offsets = [0, 2], sizes = [2, 2], strides = [1, 1]} : vector<2x8xf32> to vector<2x2xf32>
    %209 = vector.extract_strided_slice %206 {offsets = [0, 6], sizes = [2, 2], strides = [1, 1]} : vector<2x8xf32> to vector<2x2xf32>
    %210 = vector.extract_strided_slice %201 {offsets = [0, 4], sizes = [2, 2], strides = [1, 1]} : vector<2x8xf32> to vector<2x2xf32>
    %211 = math.tanh %210 : vector<2x2xf32>
    %212 = arith.mulf %208, %195 : vector<2x2xf32>
    %213 = arith.mulf %207, %211 : vector<2x2xf32>
    %214 = arith.addf %212, %213 : vector<2x2xf32>
    %215 = math.tanh %214 : vector<2x2xf32>
    %216 = arith.mulf %209, %215 : vector<2x2xf32>
    %c20 = arith.constant 20 : index
    %c0_42 = arith.constant 0 : index
    %217 = vector.load %arg7[%c20, %c0_42] : memref<32x2xf32, #tpu.memory_space<vmem>>, vector<2x2xf32>
    tpu.vector_store %arg7[%c20, %c0_42], %216 {strides = array<i32>} : memref<32x2xf32, #tpu.memory_space<vmem>>, vector<2x2xf32>,
    %218 = vector.extract_strided_slice %5 {offsets = [22, 0], sizes = [2, 8], strides = [1, 1]} : vector<32x8xf32> to vector<2x8xf32>
    %cst_43 = arith.constant dense<0.000000e+00> : vector<2x8xf32>
    %219 = tpu.matmul %216, %6, %cst_43 {dimension_numbers = #tpu.dot_dimension_numbers<[1], [0], [0], [1], [0, 0, 1, 1], [], []>} : vector<2x2xf32>, vector<2x8xf32>, vector<2x8xf32> -> vector<2x8xf32>
    %220 = arith.addf %218, %219 : vector<2x8xf32>
    %221 = arith.negf %220 : vector<2x8xf32>
    %222 = math.exp %221 : vector<2x8xf32>
    %cst_44 = arith.constant 1.000000e+00 : f32
    %223 = vector.broadcast %cst_44 : f32 to vector<2x8xf32>
    %224 = arith.addf %223, %222 : vector<2x8xf32>
    %225 = arith.divf %223, %224 : vector<2x8xf32>
    %226 = vector.extract_strided_slice %225 {offsets = [0, 0], sizes = [2, 2], strides = [1, 1]} : vector<2x8xf32> to vector<2x2xf32>
    %227 = vector.extract_strided_slice %225 {offsets = [0, 2], sizes = [2, 2], strides = [1, 1]} : vector<2x8xf32> to vector<2x2xf32>
    %228 = vector.extract_strided_slice %225 {offsets = [0, 6], sizes = [2, 2], strides = [1, 1]} : vector<2x8xf32> to vector<2x2xf32>
    %229 = vector.extract_strided_slice %220 {offsets = [0, 4], sizes = [2, 2], strides = [1, 1]} : vector<2x8xf32> to vector<2x2xf32>
    %230 = math.tanh %229 : vector<2x2xf32>
    %231 = arith.mulf %227, %214 : vector<2x2xf32>
    %232 = arith.mulf %226, %230 : vector<2x2xf32>
    %233 = arith.addf %231, %232 : vector<2x2xf32>
    %234 = math.tanh %233 : vector<2x2xf32>
    %235 = arith.mulf %228, %234 : vector<2x2xf32>
    %c22 = arith.constant 22 : index
    %c0_45 = arith.constant 0 : index
    %236 = vector.load %arg7[%c22, %c0_45] : memref<32x2xf32, #tpu.memory_space<vmem>>, vector<2x2xf32>
    tpu.vector_store %arg7[%c22, %c0_45], %235 {strides = array<i32>} : memref<32x2xf32, #tpu.memory_space<vmem>>, vector<2x2xf32>,
    %237 = vector.extract_strided_slice %5 {offsets = [24, 0], sizes = [2, 8], strides = [1, 1]} : vector<32x8xf32> to vector<2x8xf32>
    %cst_46 = arith.constant dense<0.000000e+00> : vector<2x8xf32>
    %238 = tpu.matmul %235, %6, %cst_46 {dimension_numbers = #tpu.dot_dimension_numbers<[1], [0], [0], [1], [0, 0, 1, 1], [], []>} : vector<2x2xf32>, vector<2x8xf32>, vector<2x8xf32> -> vector<2x8xf32>
    %239 = arith.addf %237, %238 : vector<2x8xf32>
    %240 = arith.negf %239 : vector<2x8xf32>
    %241 = math.exp %240 : vector<2x8xf32>
    %cst_47 = arith.constant 1.000000e+00 : f32
    %242 = vector.broadcast %cst_47 : f32 to vector<2x8xf32>
    %243 = arith.addf %242, %241 : vector<2x8xf32>
    %244 = arith.divf %242, %243 : vector<2x8xf32>
    %245 = vector.extract_strided_slice %244 {offsets = [0, 0], sizes = [2, 2], strides = [1, 1]} : vector<2x8xf32> to vector<2x2xf32>
    %246 = vector.extract_strided_slice %244 {offsets = [0, 2], sizes = [2, 2], strides = [1, 1]} : vector<2x8xf32> to vector<2x2xf32>
    %247 = vector.extract_strided_slice %244 {offsets = [0, 6], sizes = [2, 2], strides = [1, 1]} : vector<2x8xf32> to vector<2x2xf32>
    %248 = vector.extract_strided_slice %239 {offsets = [0, 4], sizes = [2, 2], strides = [1, 1]} : vector<2x8xf32> to vector<2x2xf32>
    %249 = math.tanh %248 : vector<2x2xf32>
    %250 = arith.mulf %246, %233 : vector<2x2xf32>
    %251 = arith.mulf %245, %249 : vector<2x2xf32>
    %252 = arith.addf %250, %251 : vector<2x2xf32>
    %253 = math.tanh %252 : vector<2x2xf32>
    %254 = arith.mulf %247, %253 : vector<2x2xf32>
    %c24 = arith.constant 24 : index
    %c0_48 = arith.constant 0 : index
    %255 = vector.load %arg7[%c24, %c0_48] : memref<32x2xf32, #tpu.memory_space<vmem>>, vector<2x2xf32>
    tpu.vector_store %arg7[%c24, %c0_48], %254 {strides = array<i32>} : memref<32x2xf32, #tpu.memory_space<vmem>>, vector<2x2xf32>,
    %256 = vector.extract_strided_slice %5 {offsets = [26, 0], sizes = [2, 8], strides = [1, 1]} : vector<32x8xf32> to vector<2x8xf32>
    %cst_49 = arith.constant dense<0.000000e+00> : vector<2x8xf32>
    %257 = tpu.matmul %254, %6, %cst_49 {dimension_numbers = #tpu.dot_dimension_numbers<[1], [0], [0], [1], [0, 0, 1, 1], [], []>} : vector<2x2xf32>, vector<2x8xf32>, vector<2x8xf32> -> vector<2x8xf32>
    %258 = arith.addf %256, %257 : vector<2x8xf32>
    %259 = arith.negf %258 : vector<2x8xf32>
    %260 = math.exp %259 : vector<2x8xf32>
    %cst_50 = arith.constant 1.000000e+00 : f32
    %261 = vector.broadcast %cst_50 : f32 to vector<2x8xf32>
    %262 = arith.addf %261, %260 : vector<2x8xf32>
    %263 = arith.divf %261, %262 : vector<2x8xf32>
    %264 = vector.extract_strided_slice %263 {offsets = [0, 0], sizes = [2, 2], strides = [1, 1]} : vector<2x8xf32> to vector<2x2xf32>
    %265 = vector.extract_strided_slice %263 {offsets = [0, 2], sizes = [2, 2], strides = [1, 1]} : vector<2x8xf32> to vector<2x2xf32>
    %266 = vector.extract_strided_slice %263 {offsets = [0, 6], sizes = [2, 2], strides = [1, 1]} : vector<2x8xf32> to vector<2x2xf32>
    %267 = vector.extract_strided_slice %258 {offsets = [0, 4], sizes = [2, 2], strides = [1, 1]} : vector<2x8xf32> to vector<2x2xf32>
    %268 = math.tanh %267 : vector<2x2xf32>
    %269 = arith.mulf %265, %252 : vector<2x2xf32>
    %270 = arith.mulf %264, %268 : vector<2x2xf32>
    %271 = arith.addf %269, %270 : vector<2x2xf32>
    %272 = math.tanh %271 : vector<2x2xf32>
    %273 = arith.mulf %266, %272 : vector<2x2xf32>
    %c26 = arith.constant 26 : index
    %c0_51 = arith.constant 0 : index
    %274 = vector.load %arg7[%c26, %c0_51] : memref<32x2xf32, #tpu.memory_space<vmem>>, vector<2x2xf32>
    tpu.vector_store %arg7[%c26, %c0_51], %273 {strides = array<i32>} : memref<32x2xf32, #tpu.memory_space<vmem>>, vector<2x2xf32>,
    %275 = vector.extract_strided_slice %5 {offsets = [28, 0], sizes = [2, 8], strides = [1, 1]} : vector<32x8xf32> to vector<2x8xf32>
    %cst_52 = arith.constant dense<0.000000e+00> : vector<2x8xf32>
    %276 = tpu.matmul %273, %6, %cst_52 {dimension_numbers = #tpu.dot_dimension_numbers<[1], [0], [0], [1], [0, 0, 1, 1], [], []>} : vector<2x2xf32>, vector<2x8xf32>, vector<2x8xf32> -> vector<2x8xf32>
    %277 = arith.addf %275, %276 : vector<2x8xf32>
    %278 = arith.negf %277 : vector<2x8xf32>
    %279 = math.exp %278 : vector<2x8xf32>
    %cst_53 = arith.constant 1.000000e+00 : f32
    %280 = vector.broadcast %cst_53 : f32 to vector<2x8xf32>
    %281 = arith.addf %280, %279 : vector<2x8xf32>
    %282 = arith.divf %280, %281 : vector<2x8xf32>
    %283 = vector.extract_strided_slice %282 {offsets = [0, 0], sizes = [2, 2], strides = [1, 1]} : vector<2x8xf32> to vector<2x2xf32>
    %284 = vector.extract_strided_slice %282 {offsets = [0, 2], sizes = [2, 2], strides = [1, 1]} : vector<2x8xf32> to vector<2x2xf32>
    %285 = vector.extract_strided_slice %282 {offsets = [0, 6], sizes = [2, 2], strides = [1, 1]} : vector<2x8xf32> to vector<2x2xf32>
    %286 = vector.extract_strided_slice %277 {offsets = [0, 4], sizes = [2, 2], strides = [1, 1]} : vector<2x8xf32> to vector<2x2xf32>
    %287 = math.tanh %286 : vector<2x2xf32>
    %288 = arith.mulf %284, %271 : vector<2x2xf32>
    %289 = arith.mulf %283, %287 : vector<2x2xf32>
    %290 = arith.addf %288, %289 : vector<2x2xf32>
    %291 = math.tanh %290 : vector<2x2xf32>
    %292 = arith.mulf %285, %291 : vector<2x2xf32>
    %c28 = arith.constant 28 : index
    %c0_54 = arith.constant 0 : index
    %293 = vector.load %arg7[%c28, %c0_54] : memref<32x2xf32, #tpu.memory_space<vmem>>, vector<2x2xf32>
    tpu.vector_store %arg7[%c28, %c0_54], %292 {strides = array<i32>} : memref<32x2xf32, #tpu.memory_space<vmem>>, vector<2x2xf32>,
    %294 = vector.extract_strided_slice %5 {offsets = [30, 0], sizes = [2, 8], strides = [1, 1]} : vector<32x8xf32> to vector<2x8xf32>
    %cst_55 = arith.constant dense<0.000000e+00> : vector<2x8xf32>
    %295 = tpu.matmul %292, %6, %cst_55 {dimension_numbers = #tpu.dot_dimension_numbers<[1], [0], [0], [1], [0, 0, 1, 1], [], []>} : vector<2x2xf32>, vector<2x8xf32>, vector<2x8xf32> -> vector<2x8xf32>
    %296 = arith.addf %294, %295 : vector<2x8xf32>
    %297 = arith.negf %296 : vector<2x8xf32>
    %298 = math.exp %297 : vector<2x8xf32>
    %cst_56 = arith.constant 1.000000e+00 : f32
    %299 = vector.broadcast %cst_56 : f32 to vector<2x8xf32>
    %300 = arith.addf %299, %298 : vector<2x8xf32>
    %301 = arith.divf %299, %300 : vector<2x8xf32>
    %302 = vector.extract_strided_slice %301 {offsets = [0, 0], sizes = [2, 2], strides = [1, 1]} : vector<2x8xf32> to vector<2x2xf32>
    %303 = vector.extract_strided_slice %301 {offsets = [0, 2], sizes = [2, 2], strides = [1, 1]} : vector<2x8xf32> to vector<2x2xf32>
    %304 = vector.extract_strided_slice %301 {offsets = [0, 6], sizes = [2, 2], strides = [1, 1]} : vector<2x8xf32> to vector<2x2xf32>
    %305 = vector.extract_strided_slice %296 {offsets = [0, 4], sizes = [2, 2], strides = [1, 1]} : vector<2x8xf32> to vector<2x2xf32>
    %306 = math.tanh %305 : vector<2x2xf32>
    %307 = arith.mulf %303, %290 : vector<2x2xf32>
    %308 = arith.mulf %302, %306 : vector<2x2xf32>
    %309 = arith.addf %307, %308 : vector<2x2xf32>
    %310 = math.tanh %309 : vector<2x2xf32>
    %311 = arith.mulf %304, %310 : vector<2x2xf32>
    %c30 = arith.constant 30 : index
    %c0_57 = arith.constant 0 : index
    %312 = vector.load %arg7[%c30, %c0_57] : memref<32x2xf32, #tpu.memory_space<vmem>>, vector<2x2xf32>
    tpu.vector_store %arg7[%c30, %c0_57], %311 {strides = array<i32>} : memref<32x2xf32, #tpu.memory_space<vmem>>, vector<2x2xf32>,
    %c0_58 = arith.constant 0 : index
    %c0_59 = arith.constant 0 : index
    %313 = vector.load %arg7[%c0_58, %c0_59] : memref<32x2xf32, #tpu.memory_space<vmem>>, vector<32x2xf32>
    %c0_60 = arith.constant 0 : index
    %c0_61 = arith.constant 0 : index
    %314 = vector.load %arg4[%c0_60, %c0_61] : memref<2x32xf32, #tpu.memory_space<vmem>>, vector<2x32xf32>
    %cst_62 = arith.constant dense<0.000000e+00> : vector<32x32xf32>
    %315 = tpu.matmul %313, %314, %cst_62 {dimension_numbers = #tpu.dot_dimension_numbers<[1], [0], [0], [1], [0, 0, 1, 1], [], []>} : vector<32x2xf32>, vector<2x32xf32>, vector<32x32xf32> -> vector<32x32xf32>
    %c0_63 = arith.constant 0 : index
    %c0_64 = arith.constant 0 : index
    %316 = vector.load %arg5[%c0_63, %c0_64] : memref<1x32xf32, #tpu.memory_space<vmem>>, vector<1x32xf32>
    %317 = vector.broadcast %316 : vector<1x32xf32> to vector<32x32xf32>
    %318 = arith.addf %315, %317 : vector<32x32xf32>
    %c0_65 = arith.constant 0 : index
    %c0_66 = arith.constant 0 : index
    %319 = vector.load %arg6[%c0_65, %c0_66] : memref<32x32xf32, #tpu.memory_space<vmem>>, vector<32x32xf32>
    tpu.vector_store %arg6[%c0_65, %c0_66], %318 {strides = array<i32>} : memref<32x32xf32, #tpu.memory_space<vmem>>, vector<32x32xf32>,
    return
  }
}

</mosaic_0001>

<bundles_post_ra>
// kernel: tpu_custom_call.1
= control target key start
LH: loop header
LB: loop body
LE: loop exit
PB: predicated region body
PF: predicated region fallthrough
CT: control target
= control target key end

     0   :  { %vm49_vm0 = vcmask 1041408   ;;  %vm36_vm1 = vcmask 15360   ;;  %s2736_s0 = inlined_call_operand.vmem [shape: f32[32,2], index: 0, kind: input, shape index: {}]   ;;  %s2737_s1 = inlined_call_operand.vmem [shape: f32[2,8], index: 1, kind: input, shape index: {}]   ;;  %s2738_s2 = inlined_call_operand.vmem [shape: f32[2,8], index: 2, kind: input, shape index: {}]   ;;  %s2739_s3 = inlined_call_operand.vmem [shape: f32[1,8], index: 3, kind: input, shape index: {}]   ;;  %s2740_s4 = inlined_call_operand.vmem [shape: f32[2,32], index: 4, kind: input, shape index: {}]   ;;  %s2741_s5 = inlined_call_operand.vmem [shape: f32[1,32], index: 5, kind: input, shape index: {}]   ;;  %s2742_s6 = inlined_call_operand.hbm [shape: f32[32,32], index: 6, kind: output, shape index: {}]  }
   0x1   :  { %v28_v0 = vld [vmem:[%s2737_s1] sm:$0x3]  ;;  %v26_v1 = vld [vmem:[%s2736_s0 + $0x10] sm:$0xff]  ;;  %v27_v3 = vld [vmem:[%s2736_s0 + $0x18] sm:$0xff] }
   0x2   :  { %v24_v2 = vld [vmem:[%s2736_s0] sm:$0xff]  ;;  %2223 = vmatprep.subr.msk.mxu1 %vm49_vm0, %v28_v0  ;;  %2127 = vmatprep.subr.msk.mxu0 %vm49_vm0, %v28_v0  ;;  %v25_v4 = vld [vmem:[%s2736_s0 + $0x8] sm:$0xff] }
   0x3   :  { %2224 = vmatpush3.msk.msra.mxu1 %vm49_vm0, %v28_v0  ;;  %2132 = vmatprep.mubr.msk.f32.mxu1 %vm36_vm1, %v26_v1  ;;  %v2452_v5 = vld [vmem:[%s2738_s2] sm:$0x3] }
   0x4   :  { %11 = vsyncpa [#allocation4], 0  ;;  %2128 = vmatpush3.msk.msra.mxu0 %vm49_vm0, %v28_v0  ;;  %2129 = vmatprep.mubr.msk.f32.mxu0 %vm36_vm1, %v24_v2  ;;  %v2386_v6 = vmov 0.0   ;;  %vm2387_vm2 = vmmov 0   ;;  %v2026_v7 = vld [vmem:[%s2739_s3] ss:$0 sm:$0xff] }
   0x5   :  { %2133 = vmatmul.mubr.msk.f32.vlgmr.msra.gmra.mrb[0].mxu1 %vm36_vm1, %v27_v3  ;;  %2135 = vmatprep.subr.mxu1 %v2386_v6  ;;  %s2388_s8 = smov 124   ;;  %s2389_s3 = smov 2   ;;  %vm244_vm3 = vcmask 9216   ;;  %vm353_vm4 = vcmask 11266   ;;  %vm577_vm5 = vcmask 15366   ;;  %vm465_vm6 = vcmask 13316  }
   0x6   :  { %2130 = vmatmul.mubr.msk.f32.vlgmr.msra.gmra.mrb[0].mxu0 %vm36_vm1, %v25_v4  ;;  %2136 = vmatpush3.msk.msra.mxu1 %vm49_vm0, %v2452_v5  ;;  %s2390_s9 = smov 4   ;;  %s2391_s10 = smov 122   ;;  %vm2005_vm7 = vcmask 261120  }
   0x7   :  { %2137 = vmatprep.mubr.msk.f32.mxu1 %vm2387_vm2, %v2386_v6  ;;  %2140 = vmatprep.subr.mxu1 %v2386_v6  ;;  %s2392_s14 = smov [#allocation3]  }
   0x8   :  { %2145 = vmatprep.subr.mxu0 %v2386_v6  ;;  %2147 = vmatprep.mubr.msk.f32.mxu0 %vm2387_vm2, %v2386_v6  ;;  %s2015_s15 = sshll.u32 %s2392_s14, 4  ;;  %s2016_s15 = int_to_ptr.vmem [resolvable:$true] %s2015_s15 }
   0x9   :  { %2138 = vmatmul.mubr.f32.vlgmr.msra.gmra.mrb[2].mxu1 %v2386_v6  ;;  %2146 = vmatpush3.msk.msra.mxu0 %vm49_vm0, %v2452_v5  ;;  %s2362_s16 = scalar_lea.vmem %s2016_s15, 512  ;;  %p2367_p1 = scmp.lt.s32.totalorder %s2016_s15, %s2016_s15 }
   0xa   :  { %2141 = vmatpush3.msk.msra.mxu1 %vm49_vm0, %v2452_v5  ;;  %2142 = vmatprep.mubr.msk.f32.mxu1 %vm2387_vm2, %v2386_v6  ;;  %p2363_p0 = scmp.ne.s32.totalorder %s2016_s15, %s2362_s16  ;;  %p2368_p2 = scmp.lt.s32.totalorder %s2362_s16, %s2362_s16 }
   0xb   :  { %2150 = vmatprep.subr.mxu1 %v2386_v6  ;;  %2155 = vmatprep.subr.mxu0 %v2386_v6 }
   0xc   :  { %p2369_p3 = por %p2368_p2, %p2367_p1 }
   0xe   :  { %p2370_p4 = pnand %p2369_p3, %p2363_p0 }
  0xd8   :  { %v2134_v8 = vpop.f32.mrb[0].mxu1 }
  0xd9   :  { %v2479_v9 = vadd.f32 %v2134_v8, %v2026_v7  ;;  %v2131_v10 = vpop.f32.mrb[0].mxu0  ;;  %v129_v11 = vpop.f32.mrb[1].mxu1 }
  0xda   :  { %v2481_v12 = vadd.f32 %v2131_v10, %v2026_v7  ;;  %v2483_v13 = vadd.f32 %v2026_v7, %v129_v11  ;;  %v119_v14 = vpop.f32.mrb[1].mxu0 }
  0xdb   :  { %v2485_v15 = vadd.f32 %v2026_v7, %v119_v14 }
  0xdc   :  { %v211_v16 = vpop.f32.mrb[2].mxu1 }
  0xdd   :  { %v215_v17 = vadd.f32 %v211_v16, %v2485_v15  ;;  %v2139_v18 = vpop.f32.mrb[3].mxu1 }
  0xdf   :  { %2234 = vtanh.f32 %v215_v17  ;;  %v2033_v20 = vmul.f32 -1.442695, %v215_v17 }
  0xe1   :  { %2236 = vpow2.f32 %v2033_v20 }
  0xe9   :  { %v2235_v19 = vpop.eup %2234 }
  0xea   :  { %225 = vrot.lane.b32.xlu0 %v2235_v19, %s2388_s8 }
  0xeb   :  { %v2237_v21 = vpop.eup %2236 }
  0xec   :  { %v219_v22 = vadd.f32 1.0, %v2237_v21 }
  0xee   :  { %2238 = vrcp.f32 %v219_v22 }
  0xf8   :  { %v2239_v23 = vpop.eup %2238 }
  0xf9   :  { %v223_v26 = vmul.f32 0.0, %v2239_v23 }
 0x15c   :  { %v226_v24 = vpop.permute.xlu0 %225 }
 0x15d   :  { %v228_v25 = vmul.f32 %v2239_v23, %v226_v24 }
 0x15f   :  { %230 = vrot.lane.b32.xlu0 %v228_v25, %s2389_s3 }
 0x1d1   :  { %v231_v27 = vpop.permute.xlu0 %230 }
 0x1d2   :  { %v233_v28 = vadd.f32 %v231_v27, %v223_v26 }
 0x1d4   :  { %2240 = vtanh.f32 %v233_v28  ;;  %v330_v44 = vrot.slane %v233_v28, 6 }
 0x1de   :  { %v2241_v29 = vpop.eup %2240 }
 0x1df   :  { %236 = vrot.lane.b32.xlu1 %v2241_v29, %s2390_s9 }
 0x251   :  { %v237_v30 = vpop.permute.xlu1 %236 }
 0x252   :  { %v239_v31 = vmul.f32 %v2239_v23, %v237_v30 }
 0x254   :  { %241 = vrot.lane.b32.xlu1 %v239_v31, %s2391_s10 }
 0x2c6   :  { %v242_v32 = vpop.permute.xlu1 %241 }
 0x2c7   :  { %245 = vst.msk [vmem:[#allocation2] sm:$0x3] %vm244_vm3, %v242_v32  ;;  %2143 = vmatmul.mubr.msk.f32.vlgmr.msra.gmra.mrb[4].mxu1 %vm36_vm1, %v242_v32 }
 0x2c8   :  { %2151 = vmatpush3.msk.msra.mxu1 %vm49_vm0, %v2452_v5  ;;  %2152 = vmatprep.mubr.msk.f32.mxu1 %vm2387_vm2, %v2386_v6 }
 0x2c9   :  { %2160 = vmatprep.subr.mxu1 %v2386_v6 }
 0x39a   :  { %v314_v33 = vpop.f32.mrb[4].mxu1 }
 0x39b   :  { %v319_v34 = vrot.slane %v314_v33, 6  ;;  %v2144_v35 = vpop.f32.mrb[5].mxu1 }
 0x39d   :  { %v321_v36 = vadd.f32 %v319_v34, %v2485_v15 }
 0x39f   :  { %2242 = vtanh.f32 %v321_v36  ;;  %v2036_v38 = vmul.f32 -1.442695, %v321_v36 }
 0x3a1   :  { %2244 = vpow2.f32 %v2036_v38 }
 0x3a9   :  { %v2243_v37 = vpop.eup %2242 }
 0x3aa   :  { %334 = vrot.lane.b32.xlu0 %v2243_v37, %s2388_s8 }
 0x3ab   :  { %v2245_v39 = vpop.eup %2244 }
 0x3ac   :  { %v325_v40 = vadd.f32 1.0, %v2245_v39 }
 0x3ae   :  { %2246 = vrcp.f32 %v325_v40 }
 0x3b8   :  { %v2247_v41 = vpop.eup %2246 }
 0x3b9   :  { %v332_v45 = vmul.f32 %v2247_v41, %v330_v44 }
 0x41c   :  { %v335_v42 = vpop.permute.xlu0 %334 }
 0x41d   :  { %v337_v43 = vmul.f32 %v2247_v41, %v335_v42 }
 0x41f   :  { %339 = vrot.lane.b32.xlu1 %v337_v43, %s2389_s3 }
 0x491   :  { %v340_v46 = vpop.permute.xlu1 %339 }
 0x492   :  { %v342_v47 = vadd.f32 %v340_v46, %v332_v45 }
 0x494   :  { %2248 = vtanh.f32 %v342_v47  ;;  %v442_v0 = vrot.slane %v342_v47, 6 }
 0x49e   :  { %v2249_v48 = vpop.eup %2248 }
 0x49f   :  { %345 = vrot.lane.b32.xlu0 %v2249_v48, %s2390_s9 }
 0x511   :  { %v346_v49 = vpop.permute.xlu0 %345 }
 0x512   :  { %v2503_v50 = vmul.f32 %v2247_v41, %v346_v49 }
 0x514   :  { %v355_v51 = vrot.slane %v2503_v50, 2 }
 0x516   :  { %356 = vrot.lane.b32.xlu1 %v355_v51, %s2391_s10 }
 0x588   :  { %v357_v52 = vpop.permute.xlu1 %356 }
 0x589   :  { %2148 = vmatmul.mubr.msk.f32.vlgmr.msra.gmra.mrb[2].mxu0 %vm36_vm1, %v357_v52 }
 0x58a   :  { %2156 = vmatpush3.msk.msra.mxu0 %vm49_vm0, %v2452_v5  ;;  %2157 = vmatprep.mubr.msk.f32.mxu0 %vm2387_vm2, %v2386_v6 }
 0x58b   :  { %2165 = vmatprep.subr.mxu0 %v2386_v6 }
 0x65c   :  { %v426_v53 = vpop.f32.mrb[2].mxu0 }
 0x65d   :  { %v431_v54 = vrot.slane %v426_v53, 4  ;;  %v2149_v55 = vpop.f32.mrb[3].mxu0 }
 0x65f   :  { %v433_v56 = vadd.f32 %v431_v54, %v2485_v15 }
 0x661   :  { %2250 = vtanh.f32 %v433_v56  ;;  %v2039_v58 = vmul.f32 -1.442695, %v433_v56 }
 0x663   :  { %2252 = vpow2.f32 %v2039_v58 }
 0x66b   :  { %v2251_v57 = vpop.eup %2250 }
 0x66c   :  { %446 = vrot.lane.b32.xlu0 %v2251_v57, %s2388_s8 }
 0x66d   :  { %v2253_v59 = vpop.eup %2252 }
 0x66e   :  { %v437_v60 = vadd.f32 1.0, %v2253_v59 }
 0x670   :  { %2254 = vrcp.f32 %v437_v60 }
 0x67a   :  { %v2255_v61 = vpop.eup %2254 }
 0x67b   :  { %v444_v1 = vmul.f32 %v2255_v61, %v442_v0 }
 0x6de   :  { %v447_v62 = vpop.permute.xlu0 %446 }
 0x6df   :  { %v449_v63 = vmul.f32 %v2255_v61, %v447_v62 }
 0x6e1   :  { %451 = vrot.lane.b32.xlu1 %v449_v63, %s2389_s3 }
 0x753   :  { %v452_v2 = vpop.permute.xlu1 %451 }
 0x754   :  { %v454_v3 = vadd.f32 %v452_v2, %v444_v1 }
 0x756   :  { %2256 = vtanh.f32 %v454_v3  ;;  %v554_v26 = vrot.slane %v454_v3, 6 }
 0x760   :  { %v2257_v4 = vpop.eup %2256 }
 0x761   :  { %457 = vrot.lane.b32.xlu0 %v2257_v4, %s2390_s9 }
 0x7d3   :  { %v458_v7 = vpop.permute.xlu0 %457 }
 0x7d4   :  { %v2517_v8 = vmul.f32 %v2255_v61, %v458_v7 }
 0x7d6   :  { %v467_v10 = vrot.slane %v2517_v8, 4 }
 0x7d8   :  { %468 = vrot.lane.b32.xlu1 %v467_v10, %s2391_s10 }
 0x84a   :  { %v469_v11 = vpop.permute.xlu1 %468 }
 0x84b   :  { %2153 = vmatmul.mubr.msk.f32.vlgmr.msra.gmra.mrb[6].mxu1 %vm36_vm1, %v469_v11 }
 0x84c   :  { %2161 = vmatpush3.msk.msra.mxu1 %vm49_vm0, %v2452_v5  ;;  %2162 = vmatprep.mubr.msk.f32.mxu1 %vm2387_vm2, %v2386_v6 }
 0x84d   :  { %2170 = vmatprep.subr.mxu1 %v2386_v6 }
 0x91e   :  { %v538_v14 = vpop.f32.mrb[6].mxu1 }
 0x91f   :  { %v543_v16 = vrot.slane %v538_v14, 2  ;;  %v2154_v17 = vpop.f32.mrb[7].mxu1 }
 0x921   :  { %v545_v18 = vadd.f32 %v543_v16, %v2485_v15 }
 0x923   :  { %2258 = vtanh.f32 %v545_v18  ;;  %v2042_v20 = vmul.f32 -1.442695, %v545_v18 }
 0x925   :  { %2260 = vpow2.f32 %v2042_v20 }
 0x92d   :  { %v2259_v19 = vpop.eup %2258 }
 0x92e   :  { %558 = vrot.lane.b32.xlu0 %v2259_v19, %s2388_s8 }
 0x92f   :  { %v2261_v21 = vpop.eup %2260 }
 0x930   :  { %v549_v22 = vadd.f32 1.0, %v2261_v21 }
 0x932   :  { %2262 = vrcp.f32 %v549_v22 }
 0x93c   :  { %v2263_v23 = vpop.eup %2262 }
 0x93d   :  { %v556_v27 = vmul.f32 %v2263_v23, %v554_v26 }
 0x9a0   :  { %v559_v24 = vpop.permute.xlu0 %558 }
 0x9a1   :  { %v561_v25 = vmul.f32 %v2263_v23, %v559_v24 }
 0x9a3   :  { %563 = vrot.lane.b32.xlu1 %v561_v25, %s2389_s3 }
 0xa15   :  { %v564_v28 = vpop.permute.xlu1 %563 }
 0xa16   :  { %v566_v29 = vadd.f32 %v564_v28, %v556_v27 }
 0xa18   :  { %2264 = vtanh.f32 %v566_v29  ;;  %v663_v44 = vrot.slane %v566_v29, 6 }
 0xa22   :  { %v2265_v15 = vpop.eup %2264 }
 0xa23   :  { %569 = vrot.lane.b32.xlu0 %v2265_v15, %s2390_s9 }
 0xa95   :  { %v570_v30 = vpop.permute.xlu0 %569 }
 0xa96   :  { %v2531_v31 = vmul.f32 %v2263_v23, %v570_v30 }
 0xa98   :  { %v579_v32 = vrot.slane %v2531_v31, 6 }
 0xa9a   :  { %580 = vrot.lane.b32.xlu1 %v579_v32, %s2391_s10 }
 0xb0c   :  { %v581_v33 = vpop.permute.xlu1 %580 }
 0xb0d   :  { %2158 = vmatmul.mubr.msk.f32.vlgmr.msra.gmra.mrb[4].mxu0 %vm36_vm1, %v581_v33 }
 0xb0e   :  { %2166 = vmatpush3.msk.msra.mxu0 %vm49_vm0, %v2452_v5  ;;  %2167 = vmatprep.mubr.msk.f32.mxu0 %vm2387_vm2, %v2386_v6 }
 0xb0f   :  { %2175 = vmatprep.subr.mxu0 %v2386_v6 }
 0xbe0   :  { %v650_v34 = vpop.f32.mrb[4].mxu0 }
 0xbe1   :  { %v654_v35 = vadd.f32 %v650_v34, %v2481_v12  ;;  %v2159_v36 = vpop.f32.mrb[5].mxu0 }
 0xbe3   :  { %2266 = vtanh.f32 %v654_v35  ;;  %v2045_v38 = vmul.f32 -1.442695, %v654_v35 }
 0xbe5   :  { %2268 = vpow2.f32 %v2045_v38 }
 0xbed   :  { %v2267_v37 = vpop.eup %2266 }
 0xbee   :  { %667 = vrot.lane.b32.xlu0 %v2267_v37, %s2388_s8 }
 0xbef   :  { %v2269_v39 = vpop.eup %2268 }
 0xbf0   :  { %v658_v40 = vadd.f32 1.0, %v2269_v39 }
 0xbf2   :  { %2270 = vrcp.f32 %v658_v40 }
 0xbfc   :  { %v2271_v41 = vpop.eup %2270 }
 0xbfd   :  { %v665_v45 = vmul.f32 %v2271_v41, %v663_v44 }
 0xc60   :  { %v668_v42 = vpop.permute.xlu0 %667 }
 0xc61   :  { %v670_v43 = vmul.f32 %v2271_v41, %v668_v42 }
 0xc63   :  { %672 = vrot.lane.b32.xlu1 %v670_v43, %s2389_s3 }
 0xcd5   :  { %v673_v46 = vpop.permute.xlu1 %672 }
 0xcd6   :  { %v675_v47 = vadd.f32 %v673_v46, %v665_v45 }
 0xcd8   :  { %2272 = vtanh.f32 %v675_v47  ;;  %v771_v0 = vrot.slane %v675_v47, 6 }
 0xce2   :  { %v2273_v48 = vpop.eup %2272 }
 0xce3   :  { %678 = vrot.lane.b32.xlu0 %v2273_v48, %s2390_s9 }
 0xd55   :  { %v679_v49 = vpop.permute.xlu0 %678 }
 0xd56   :  { %v681_v51 = vmul.f32 %v2271_v41, %v679_v49 }
 0xd58   :  { %683 = vrot.lane.b32.xlu1 %v681_v51, %s2391_s10 }
 0xdca   :  { %v684_v52 = vpop.permute.xlu1 %683 }
 0xdcb   :  { %686 = vst.msk [vmem:[#allocation2 + $0x8] sm:$0x3] %vm244_vm3, %v684_v52  ;;  %2163 = vmatmul.mubr.msk.f32.vlgmr.msra.gmra.mrb[8].mxu1 %vm36_vm1, %v684_v52 }
 0xdcc   :  { %2171 = vmatpush3.msk.msra.mxu1 %vm49_vm0, %v2452_v5  ;;  %2172 = vmatprep.mubr.msk.f32.mxu1 %vm2387_vm2, %v2386_v6 }
 0xdcd   :  { %2180 = vmatprep.subr.mxu1 %v2386_v6 }
 0xe9e   :  { %v755_v53 = vpop.f32.mrb[8].mxu1 }
 0xe9f   :  { %v760_v54 = vrot.slane %v755_v53, 6  ;;  %v2164_v55 = vpop.f32.mrb[9].mxu1 }
 0xea1   :  { %v762_v56 = vadd.f32 %v760_v54, %v2481_v12 }
 0xea3   :  { %2274 = vtanh.f32 %v762_v56  ;;  %v2048_v58 = vmul.f32 -1.442695, %v762_v56 }
 0xea5   :  { %2276 = vpow2.f32 %v2048_v58 }
 0xead   :  { %v2275_v57 = vpop.eup %2274 }
 0xeae   :  { %775 = vrot.lane.b32.xlu0 %v2275_v57, %s2388_s8 }
 0xeaf   :  { %v2277_v59 = vpop.eup %2276 }
 0xeb0   :  { %v766_v60 = vadd.f32 1.0, %v2277_v59 }
 0xeb2   :  { %2278 = vrcp.f32 %v766_v60 }
 0xebc   :  { %v2279_v61 = vpop.eup %2278 }
 0xebd   :  { %v773_v1 = vmul.f32 %v2279_v61, %v771_v0 }
 0xf20   :  { %v776_v62 = vpop.permute.xlu0 %775 }
 0xf21   :  { %v778_v63 = vmul.f32 %v2279_v61, %v776_v62 }
 0xf23   :  { %780 = vrot.lane.b32.xlu1 %v778_v63, %s2389_s3 }
 0xf95   :  { %v781_v2 = vpop.permute.xlu1 %780 }
 0xf96   :  { %v783_v3 = vadd.f32 %v781_v2, %v773_v1 }
 0xf98   :  { %2280 = vtanh.f32 %v783_v3  ;;  %v882_v27 = vrot.slane %v783_v3, 6 }
 0xfa2   :  { %v2281_v4 = vpop.eup %2280 }
 0xfa3   :  { %786 = vrot.lane.b32.xlu0 %v2281_v4, %s2390_s9 }
0x1015   :  { %v787_v7 = vpop.permute.xlu0 %786 }
0x1016   :  { %v2557_v10 = vmul.f32 %v2279_v61, %v787_v7 }
0x1018   :  { %v795_v11 = vrot.slane %v2557_v10, 2 }
0x101a   :  { %796 = vrot.lane.b32.xlu1 %v795_v11, %s2391_s10 }
0x108c   :  { %v797_v14 = vpop.permute.xlu1 %796 }
0x108d   :  { %2168 = vmatmul.mubr.msk.f32.vlgmr.msra.gmra.mrb[6].mxu0 %vm36_vm1, %v797_v14 }
0x108e   :  { %2176 = vmatpush3.msk.msra.mxu0 %vm49_vm0, %v2452_v5  ;;  %2177 = vmatprep.mubr.msk.f32.mxu0 %vm2387_vm2, %v2386_v6 }
0x108f   :  { %2185 = vmatprep.subr.mxu0 %v2386_v6 }
0x1160   :  { %v866_v16 = vpop.f32.mrb[6].mxu0 }
0x1161   :  { %v871_v17 = vrot.slane %v866_v16, 4  ;;  %v2169_v18 = vpop.f32.mrb[7].mxu0 }
0x1163   :  { %v873_v19 = vadd.f32 %v871_v17, %v2481_v12 }
0x1165   :  { %2282 = vtanh.f32 %v873_v19  ;;  %v2051_v21 = vmul.f32 -1.442695, %v873_v19 }
0x1167   :  { %2284 = vpow2.f32 %v2051_v21 }
0x116f   :  { %v2283_v20 = vpop.eup %2282 }
0x1170   :  { %886 = vrot.lane.b32.xlu0 %v2283_v20, %s2388_s8 }
0x1171   :  { %v2285_v22 = vpop.eup %2284 }
0x1172   :  { %v877_v23 = vadd.f32 1.0, %v2285_v22 }
0x1174   :  { %2286 = vrcp.f32 %v877_v23 }
0x117e   :  { %v2287_v24 = vpop.eup %2286 }
0x117f   :  { %v884_v28 = vmul.f32 %v2287_v24, %v882_v27 }
0x11e2   :  { %v887_v25 = vpop.permute.xlu0 %886 }
0x11e3   :  { %v889_v26 = vmul.f32 %v2287_v24, %v887_v25 }
0x11e5   :  { %891 = vrot.lane.b32.xlu1 %v889_v26, %s2389_s3 }
0x1257   :  { %v892_v29 = vpop.permute.xlu1 %891 }
0x1258   :  { %v894_v15 = vadd.f32 %v892_v29, %v884_v28 }
0x125a   :  { %2288 = vtanh.f32 %v894_v15  ;;  %v993_v47 = vrot.slane %v894_v15, 6 }
0x1264   :  { %v2289_v30 = vpop.eup %2288 }
0x1265   :  { %897 = vrot.lane.b32.xlu0 %v2289_v30, %s2390_s9 }
0x12d7   :  { %v898_v32 = vpop.permute.xlu0 %897 }
0x12d8   :  { %v2571_v33 = vmul.f32 %v2287_v24, %v898_v32 }
0x12da   :  { %v906_v34 = vrot.slane %v2571_v33, 4 }
0x12dc   :  { %907 = vrot.lane.b32.xlu1 %v906_v34, %s2391_s10 }
0x134e   :  { %v908_v35 = vpop.permute.xlu1 %907 }
0x134f   :  { %2173 = vmatmul.mubr.msk.f32.vlgmr.msra.gmra.mrb[10].mxu1 %vm36_vm1, %v908_v35 }
0x1350   :  { %2181 = vmatpush3.msk.msra.mxu1 %vm49_vm0, %v2452_v5  ;;  %2182 = vmatprep.mubr.msk.f32.mxu1 %vm2387_vm2, %v2386_v6 }
0x1351   :  { %2190 = vmatprep.subr.mxu1 %v2386_v6 }
0x1422   :  { %v977_v36 = vpop.f32.mrb[10].mxu1 }
0x1423   :  { %v982_v37 = vrot.slane %v977_v36, 2  ;;  %v2174_v38 = vpop.f32.mrb[11].mxu1 }
0x1425   :  { %v984_v39 = vadd.f32 %v982_v37, %v2481_v12 }
0x1427   :  { %2290 = vtanh.f32 %v984_v39  ;;  %v2054_v41 = vmul.f32 -1.442695, %v984_v39 }
0x1429   :  { %2292 = vpow2.f32 %v2054_v41 }
0x1431   :  { %v2291_v40 = vpop.eup %2290 }
0x1432   :  { %997 = vrot.lane.b32.xlu0 %v2291_v40, %s2388_s8 }
0x1433   :  { %v2293_v42 = vpop.eup %2292 }
0x1434   :  { %v988_v43 = vadd.f32 1.0, %v2293_v42 }
0x1436   :  { %2294 = vrcp.f32 %v988_v43 }
0x1440   :  { %v2295_v44 = vpop.eup %2294 }
0x1441   :  { %v995_v48 = vmul.f32 %v2295_v44, %v993_v47 }
0x14a4   :  { %v998_v45 = vpop.permute.xlu0 %997 }
0x14a5   :  { %v1000_v46 = vmul.f32 %v2295_v44, %v998_v45 }
0x14a7   :  { %1002 = vrot.lane.b32.xlu1 %v1000_v46, %s2389_s3 }
0x1519   :  { %v1003_v49 = vpop.permute.xlu1 %1002 }
0x151a   :  { %v1005_v51 = vadd.f32 %v1003_v49, %v995_v48 }
0x151c   :  { %2296 = vtanh.f32 %v1005_v51  ;;  %v1101_v2 = vrot.slane %v1005_v51, 6 }
0x1526   :  { %v2297_v12 = vpop.eup %2296 }
0x1527   :  { %1008 = vrot.lane.b32.xlu0 %v2297_v12, %s2390_s9 }
0x1599   :  { %v1009_v52 = vpop.permute.xlu0 %1008 }
0x159a   :  { %v2585_v53 = vmul.f32 %v2295_v44, %v1009_v52 }
0x159c   :  { %v1017_v54 = vrot.slane %v2585_v53, 6 }
0x159e   :  { %1018 = vrot.lane.b32.xlu1 %v1017_v54, %s2391_s10 }
0x1610   :  { %v1019_v55 = vpop.permute.xlu1 %1018 }
0x1611   :  { %2178 = vmatmul.mubr.msk.f32.vlgmr.msra.gmra.mrb[8].mxu0 %vm36_vm1, %v1019_v55 }
0x1612   :  { %2186 = vmatpush3.msk.msra.mxu0 %vm49_vm0, %v2452_v5  ;;  %2187 = vmatprep.mubr.msk.f32.mxu0 %vm2387_vm2, %v2386_v6 }
0x1613   :  { %2195 = vmatprep.subr.mxu0 %v2386_v6 }
0x16e4   :  { %v1088_v56 = vpop.f32.mrb[8].mxu0 }
0x16e5   :  { %v1092_v57 = vadd.f32 %v1088_v56, %v2483_v13  ;;  %v2179_v58 = vpop.f32.mrb[9].mxu0 }
0x16e7   :  { %2298 = vtanh.f32 %v1092_v57  ;;  %v2057_v60 = vmul.f32 -1.442695, %v1092_v57 }
0x16e9   :  { %2300 = vpow2.f32 %v2057_v60 }
0x16f1   :  { %v2299_v59 = vpop.eup %2298 }
0x16f2   :  { %1105 = vrot.lane.b32.xlu0 %v2299_v59, %s2388_s8 }
0x16f3   :  { %v2301_v61 = vpop.eup %2300 }
0x16f4   :  { %v1096_v62 = vadd.f32 1.0, %v2301_v61 }
0x16f6   :  { %2302 = vrcp.f32 %v1096_v62 }
0x1700   :  { %v2303_v63 = vpop.eup %2302 }
0x1701   :  { %v1103_v3 = vmul.f32 %v2303_v63, %v1101_v2 }
0x1764   :  { %v1106_v0 = vpop.permute.xlu0 %1105 }
0x1765   :  { %v1108_v1 = vmul.f32 %v2303_v63, %v1106_v0 }
0x1767   :  { %1110 = vrot.lane.b32.xlu1 %v1108_v1, %s2389_s3 }
0x17d9   :  { %v1111_v4 = vpop.permute.xlu1 %1110 }
0x17da   :  { %v1113_v7 = vadd.f32 %v1111_v4, %v1103_v3 }
0x17dc   :  { %2304 = vtanh.f32 %v1113_v7  ;;  %v1209_v29 = vrot.slane %v1113_v7, 6 }
0x17e6   :  { %v2305_v11 = vpop.eup %2304 }
0x17e7   :  { %1116 = vrot.lane.b32.xlu0 %v2305_v11, %s2390_s9 }
0x1859   :  { %v1117_v14 = vpop.permute.xlu0 %1116 }
0x185a   :  { %v1119_v16 = vmul.f32 %v2303_v63, %v1117_v14 }
0x185c   :  { %1121 = vrot.lane.b32.xlu1 %v1119_v16, %s2391_s10 }
0x18ce   :  { %v1122_v17 = vpop.permute.xlu1 %1121 }
0x18cf   :  { %1124 = vst.msk [vmem:[#allocation2 + $0x10] sm:$0x3] %vm244_vm3, %v1122_v17  ;;  %2183 = vmatmul.mubr.msk.f32.vlgmr.msra.gmra.mrb[12].mxu1 %vm36_vm1, %v1122_v17 }
0x18d0   :  { %2191 = vmatpush3.msk.msra.mxu1 %vm49_vm0, %v2452_v5  ;;  %2192 = vmatprep.mubr.msk.f32.mxu1 %vm2387_vm2, %v2386_v6 }
0x18d1   :  { %2200 = vmatprep.subr.mxu1 %v2386_v6 }
0x19a2   :  { %v1193_v18 = vpop.f32.mrb[12].mxu1 }
0x19a3   :  { %v1198_v19 = vrot.slane %v1193_v18, 6  ;;  %v2184_v20 = vpop.f32.mrb[13].mxu1 }
0x19a5   :  { %v1200_v21 = vadd.f32 %v1198_v19, %v2483_v13 }
0x19a7   :  { %2306 = vtanh.f32 %v1200_v21  ;;  %v2060_v23 = vmul.f32 -1.442695, %v1200_v21 }
0x19a9   :  { %2308 = vpow2.f32 %v2060_v23 }
0x19b1   :  { %v2307_v22 = vpop.eup %2306 }
0x19b2   :  { %1213 = vrot.lane.b32.xlu0 %v2307_v22, %s2388_s8 }
0x19b3   :  { %v2309_v24 = vpop.eup %2308 }
0x19b4   :  { %v1204_v25 = vadd.f32 1.0, %v2309_v24 }
0x19b6   :  { %2310 = vrcp.f32 %v1204_v25 }
0x19c0   :  { %v2311_v26 = vpop.eup %2310 }
0x19c1   :  { %v1211_v15 = vmul.f32 %v2311_v26, %v1209_v29 }
0x1a24   :  { %v1214_v27 = vpop.permute.xlu0 %1213 }
0x1a25   :  { %v1216_v28 = vmul.f32 %v2311_v26, %v1214_v27 }
0x1a27   :  { %1218 = vrot.lane.b32.xlu1 %v1216_v28, %s2389_s3 }
0x1a99   :  { %v1219_v30 = vpop.permute.xlu1 %1218 }
0x1a9a   :  { %v1221_v32 = vadd.f32 %v1219_v30, %v1211_v15 }
0x1a9c   :  { %2312 = vtanh.f32 %v1221_v32  ;;  %v1320_v51 = vrot.slane %v1221_v32, 6 }
0x1aa6   :  { %v2313_v34 = vpop.eup %2312 }
0x1aa7   :  { %1224 = vrot.lane.b32.xlu0 %v2313_v34, %s2390_s9 }
0x1b19   :  { %v1225_v35 = vpop.permute.xlu0 %1224 }
0x1b1a   :  { %v2611_v36 = vmul.f32 %v2311_v26, %v1225_v35 }
0x1b1c   :  { %v1233_v37 = vrot.slane %v2611_v36, 2 }
0x1b1e   :  { %1234 = vrot.lane.b32.xlu1 %v1233_v37, %s2391_s10 }
0x1b90   :  { %v1235_v38 = vpop.permute.xlu1 %1234 }
0x1b91   :  { %2188 = vmatmul.mubr.msk.f32.vlgmr.msra.gmra.mrb[10].mxu0 %vm36_vm1, %v1235_v38 }
0x1b92   :  { %2196 = vmatpush3.msk.msra.mxu0 %vm49_vm0, %v2452_v5  ;;  %2197 = vmatprep.mubr.msk.f32.mxu0 %vm2387_vm2, %v2386_v6 }
0x1b93   :  { %2205 = vmatprep.subr.mxu0 %v2386_v6 }
0x1c64   :  { %v1304_v39 = vpop.f32.mrb[10].mxu0 }
0x1c65   :  { %v1309_v40 = vrot.slane %v1304_v39, 4  ;;  %v2189_v41 = vpop.f32.mrb[11].mxu0 }
0x1c67   :  { %v1311_v42 = vadd.f32 %v1309_v40, %v2483_v13 }
0x1c69   :  { %2314 = vtanh.f32 %v1311_v42  ;;  %v2063_v44 = vmul.f32 -1.442695, %v1311_v42 }
0x1c6b   :  { %2316 = vpow2.f32 %v2063_v44 }
0x1c73   :  { %v2315_v43 = vpop.eup %2314 }
0x1c74   :  { %1324 = vrot.lane.b32.xlu0 %v2315_v43, %s2388_s8 }
0x1c75   :  { %v2317_v45 = vpop.eup %2316 }
0x1c76   :  { %v1315_v46 = vadd.f32 1.0, %v2317_v45 }
0x1c78   :  { %2318 = vrcp.f32 %v1315_v46 }
0x1c82   :  { %v2319_v47 = vpop.eup %2318 }
0x1c83   :  { %v1322_v12 = vmul.f32 %v2319_v47, %v1320_v51 }
0x1ce6   :  { %v1325_v48 = vpop.permute.xlu0 %1324 }
0x1ce7   :  { %v1327_v49 = vmul.f32 %v2319_v47, %v1325_v48 }
0x1ce9   :  { %1329 = vrot.lane.b32.xlu1 %v1327_v49, %s2389_s3 }
0x1d5b   :  { %v1330_v52 = vpop.permute.xlu1 %1329 }
0x1d5c   :  { %v1332_v54 = vadd.f32 %v1330_v52, %v1322_v12 }
0x1d5e   :  { %2320 = vtanh.f32 %v1332_v54  ;;  %v1431_v14 = vrot.slane %v1332_v54, 6 }
0x1d68   :  { %v2321_v55 = vpop.eup %2320 }
0x1d69   :  { %1335 = vrot.lane.b32.xlu0 %v2321_v55, %s2390_s9 }
0x1ddb   :  { %v1336_v56 = vpop.permute.xlu0 %1335 }
0x1ddc   :  { %v2625_v57 = vmul.f32 %v2319_v47, %v1336_v56 }
0x1dde   :  { %v1344_v58 = vrot.slane %v2625_v57, 4 }
0x1de0   :  { %1345 = vrot.lane.b32.xlu1 %v1344_v58, %s2391_s10 }
0x1e52   :  { %v1346_v59 = vpop.permute.xlu1 %1345 }
0x1e53   :  { %2193 = vmatmul.mubr.msk.f32.vlgmr.msra.gmra.mrb[14].mxu1 %vm36_vm1, %v1346_v59 }
0x1e54   :  { %2201 = vmatpush3.msk.msra.mxu1 %vm49_vm0, %v2452_v5  ;;  %2202 = vmatprep.mubr.msk.f32.mxu1 %vm2387_vm2, %v2386_v6 }
0x1e55   :  { %2210 = vmatprep.subr.mxu1 %v2386_v6 }
0x1f26   :  { %v1415_v60 = vpop.f32.mrb[14].mxu1 }
0x1f27   :  { %v1420_v61 = vrot.slane %v1415_v60, 2  ;;  %v2194_v62 = vpop.f32.mrb[15].mxu1 }
0x1f29   :  { %v1422_v63 = vadd.f32 %v1420_v61, %v2483_v13 }
0x1f2b   :  { %2322 = vtanh.f32 %v1422_v63  ;;  %v2066_v1 = vmul.f32 -1.442695, %v1422_v63 }
0x1f2d   :  { %2324 = vpow2.f32 %v2066_v1 }
0x1f35   :  { %v2323_v0 = vpop.eup %2322 }
0x1f36   :  { %1435 = vrot.lane.b32.xlu0 %v2323_v0, %s2388_s8 }
0x1f37   :  { %v2325_v2 = vpop.eup %2324 }
0x1f38   :  { %v1426_v3 = vadd.f32 1.0, %v2325_v2 }
0x1f3a   :  { %2326 = vrcp.f32 %v1426_v3 }
0x1f44   :  { %v2327_v4 = vpop.eup %2326 }
0x1f45   :  { %v1433_v16 = vmul.f32 %v2327_v4, %v1431_v14 }
0x1fa8   :  { %v1436_v7 = vpop.permute.xlu0 %1435 }
0x1fa9   :  { %v1438_v11 = vmul.f32 %v2327_v4, %v1436_v7 }
0x1fab   :  { %1440 = vrot.lane.b32.xlu1 %v1438_v11, %s2389_s3 }
0x201d   :  { %v1441_v17 = vpop.permute.xlu1 %1440 }
0x201e   :  { %v1443_v18 = vadd.f32 %v1441_v17, %v1433_v16 }
0x2020   :  { %2328 = vtanh.f32 %v1443_v18  ;;  %v1539_v34 = vrot.slane %v1443_v18, 6 }
0x202a   :  { %v2329_v13 = vpop.eup %2328 }
0x202b   :  { %1446 = vrot.lane.b32.xlu0 %v2329_v13, %s2390_s9 }
0x209d   :  { %v1447_v19 = vpop.permute.xlu0 %1446 }
0x209e   :  { %v2639_v20 = vmul.f32 %v2327_v4, %v1447_v19 }
0x20a0   :  { %v1455_v21 = vrot.slane %v2639_v20, 6 }
0x20a2   :  { %1456 = vrot.lane.b32.xlu1 %v1455_v21, %s2391_s10 }
0x2114   :  { %v1457_v22 = vpop.permute.xlu1 %1456 }
0x2115   :  { %2198 = vmatmul.mubr.msk.f32.vlgmr.msra.gmra.mrb[12].mxu0 %vm36_vm1, %v1457_v22 }
0x2116   :  { %2206 = vmatpush3.msk.msra.mxu0 %vm49_vm0, %v2452_v5  ;;  %2207 = vmatprep.mubr.msk.f32.mxu0 %vm2387_vm2, %v2386_v6 }
0x21e8   :  { %v1526_v23 = vpop.f32.mrb[12].mxu0 }
0x21e9   :  { %v1530_v24 = vadd.f32 %v1526_v23, %v2479_v9  ;;  %v2199_v25 = vpop.f32.mrb[13].mxu0 }
0x21eb   :  { %2330 = vtanh.f32 %v1530_v24  ;;  %v2069_v27 = vmul.f32 -1.442695, %v1530_v24 }
0x21ed   :  { %2332 = vpow2.f32 %v2069_v27 }
0x21f5   :  { %v2331_v26 = vpop.eup %2330 }
0x21f6   :  { %1543 = vrot.lane.b32.xlu0 %v2331_v26, %s2388_s8 }
0x21f7   :  { %v2333_v28 = vpop.eup %2332 }
0x21f8   :  { %v1534_v29 = vadd.f32 1.0, %v2333_v28 }
0x21fa   :  { %2334 = vrcp.f32 %v1534_v29 }
0x2204   :  { %v2335_v15 = vpop.eup %2334 }
0x2205   :  { %v1541_v35 = vmul.f32 %v2335_v15, %v1539_v34 }
0x2268   :  { %v1544_v30 = vpop.permute.xlu0 %1543 }
0x2269   :  { %v1546_v32 = vmul.f32 %v2335_v15, %v1544_v30 }
0x226b   :  { %1548 = vrot.lane.b32.xlu1 %v1546_v32, %s2389_s3 }
0x22dd   :  { %v1549_v37 = vpop.permute.xlu1 %1548 }
0x22de   :  { %v1551_v38 = vadd.f32 %v1549_v37, %v1541_v35 }
0x22e0   :  { %2336 = vtanh.f32 %v1551_v38 }
0x22ea   :  { %v2337_v39 = vpop.eup %2336 }
0x22eb   :  { %1554 = vrot.lane.b32.xlu0 %v2337_v39, %s2390_s9 }
0x235d   :  { %v1555_v40 = vpop.permute.xlu0 %1554 }
0x235e   :  { %v1557_v41 = vmul.f32 %v2335_v15, %v1555_v40 }
0x2360   :  { %1559 = vrot.lane.b32.xlu1 %v1557_v41, %s2391_s10 }
0x23d2   :  { %v1560_v42 = vpop.permute.xlu1 %1559 }
0x23d3   :  { %1562 = vst.msk [vmem:[#allocation2 + $0x18] sm:$0x3] %vm244_vm3, %v1560_v42  ;;  %2203 = vmatmul.mubr.msk.f32.vlgmr.msra.gmra.mrb[16].mxu1 %vm36_vm1, %v1560_v42 }
0x23d4   :  { %2211 = vmatpush3.msk.msra.mxu1 %vm49_vm0, %v2452_v5  ;;  %2212 = vmatprep.mubr.msk.f32.mxu1 %vm2387_vm2, %v2386_v6  ;;  %v1647_v6 = vrot.slane %v1551_v38, 6 }
0x24a6   :  { %v1631_v43 = vpop.f32.mrb[16].mxu1 }
0x24a7   :  { %v1636_v44 = vrot.slane %v1631_v43, 6  ;;  %v2204_v45 = vpop.f32.mrb[17].mxu1  ;;  %v1897_v43 = vld [vmem:[%s2740_s4] sm:$0x3] }
0x24a8   :  { %2215 = vmatprep.subr.msk.mxu0 %vm49_vm0, %v1897_v43 }
0x24a9   :  { %v1638_v46 = vadd.f32 %v1636_v44, %v2479_v9 }
0x24ab   :  { %2338 = vtanh.f32 %v1638_v46  ;;  %v2072_v48 = vmul.f32 -1.442695, %v1638_v46 }
0x24ad   :  { %2340 = vpow2.f32 %v2072_v48 }
0x24b5   :  { %v2339_v47 = vpop.eup %2338 }
0x24b6   :  { %1651 = vrot.lane.b32.xlu0 %v2339_v47, %s2388_s8 }
0x24b7   :  { %v2341_v49 = vpop.eup %2340 }
0x24b8   :  { %v1642_v51 = vadd.f32 1.0, %v2341_v49 }
0x24ba   :  { %2342 = vrcp.f32 %v1642_v51 }
0x24c4   :  { %v2343_v12 = vpop.eup %2342 }
0x24c5   :  { %v1649_v54 = vmul.f32 %v2343_v12, %v1647_v6  ;;  %v2079_v6 = vld [vmem:[%s2741_s5] ss:$0 sm:$0xff] }
0x2528   :  { %v1652_v52 = vpop.permute.xlu0 %1651 }
0x2529   :  { %v1654_v5 = vmul.f32 %v2343_v12, %v1652_v52 }
0x252b   :  { %1656 = vrot.lane.b32.xlu1 %v1654_v5, %s2389_s3 }
0x259d   :  { %v1657_v55 = vpop.permute.xlu1 %1656 }
0x259e   :  { %v1659_v56 = vadd.f32 %v1657_v55, %v1649_v54 }
0x25a0   :  { %2344 = vtanh.f32 %v1659_v56  ;;  %v1758_v18 = vrot.slane %v1659_v56, 6 }
0x25aa   :  { %v2345_v58 = vpop.eup %2344 }
0x25ab   :  { %1662 = vrot.lane.b32.xlu0 %v2345_v58, %s2390_s9 }
0x261d   :  { %v1663_v59 = vpop.permute.xlu0 %1662 }
0x261e   :  { %v2663_v60 = vmul.f32 %v2343_v12, %v1663_v59 }
0x2620   :  { %v1671_v61 = vrot.slane %v2663_v60, 2 }
0x2622   :  { %1672 = vrot.lane.b32.xlu1 %v1671_v61, %s2391_s10 }
0x2694   :  { %v1673_v62 = vpop.permute.xlu1 %1672 }
0x2695   :  { %2208 = vmatmul.mubr.msk.f32.vlgmr.msra.gmra.mrb[14].mxu0 %vm36_vm1, %v1673_v62 }
0x2696   :  { %2216 = vmatpush3.msk.msra.mxu0 %vm49_vm0, %v1897_v43 }
0x2768   :  { %v1742_v63 = vpop.f32.mrb[14].mxu0 }
0x2769   :  { %v1747_v0 = vrot.slane %v1742_v63, 4  ;;  %v2209_v1 = vpop.f32.mrb[15].mxu0 }
0x276b   :  { %v1749_v2 = vadd.f32 %v1747_v0, %v2479_v9 }
0x276d   :  { %2346 = vtanh.f32 %v1749_v2  ;;  %v2075_v4 = vmul.f32 -1.442695, %v1749_v2 }
0x276f   :  { %2348 = vpow2.f32 %v2075_v4 }
0x2777   :  { %v2347_v3 = vpop.eup %2346 }
0x2778   :  { %1762 = vrot.lane.b32.xlu0 %v2347_v3, %s2388_s8 }
0x2779   :  { %v2349_v7 = vpop.eup %2348 }
0x277a   :  { %v1753_v11 = vadd.f32 1.0, %v2349_v7 }
0x277c   :  { %2350 = vrcp.f32 %v1753_v11 }
0x2786   :  { %v2351_v14 = vpop.eup %2350 }
0x2787   :  { %v1760_v13 = vmul.f32 %v2351_v14, %v1758_v18 }
0x27ea   :  { %v1763_v16 = vpop.permute.xlu0 %1762 }
0x27eb   :  { %v1765_v17 = vmul.f32 %v2351_v14, %v1763_v16 }
0x27ed   :  { %1767 = vrot.lane.b32.xlu1 %v1765_v17, %s2389_s3 }
0x285f   :  { %v1768_v19 = vpop.permute.xlu1 %1767 }
0x2860   :  { %v1770_v21 = vadd.f32 %v1768_v19, %v1760_v13 }
0x2862   :  { %2352 = vtanh.f32 %v1770_v21 }
0x286c   :  { %v2353_v22 = vpop.eup %2352 }
0x286d   :  { %1773 = vrot.lane.b32.xlu0 %v2353_v22, %s2390_s9 }
0x28df   :  { %v1774_v23 = vpop.permute.xlu0 %1773 }
0x28e0   :  { %v1776_v24 = vmul.f32 %v2351_v14, %v1774_v23 }
0x28e2   :  { %v1782_v25 = vrot.slane %v1776_v24, 4 }
0x28e4   :  { %1783 = vrot.lane.b32.xlu1 %v1782_v25, %s2391_s10 }
0x2956   :  { %v1784_v26 = vpop.permute.xlu1 %1783 }
0x2957   :  { %2213 = vmatmul.mubr.msk.f32.vlgmr.msra.gmra.mrb[18].mxu1 %vm36_vm1, %v1784_v26 }
0x2a2a   :  { %v1853_v27 = vpop.f32.mrb[18].mxu1 }
0x2a2b   :  { %v1858_v28 = vrot.slane %v1853_v27, 2  ;;  %v2214_v29 = vpop.f32.mrb[19].mxu1 }
0x2a2d   :  { %v1860_v15 = vadd.f32 %v1858_v28, %v2479_v9  ;;  %v1869_v9 = vrot.slane %v1770_v21, 6 }
0x2a2f   :  { %2354 = vtanh.f32 %v1860_v15  ;;  %v2078_v32 = vmul.f32 -1.442695, %v1860_v15 }
0x2a31   :  { %2356 = vpow2.f32 %v2078_v32 }
0x2a39   :  { %v2355_v30 = vpop.eup %2354 }
0x2a3a   :  { %1873 = vrot.lane.b32.xlu0 %v2355_v30, %s2388_s8 }
0x2a3b   :  { %v2357_v34 = vpop.eup %2356 }
0x2a3c   :  { %v1864_v35 = vadd.f32 1.0, %v2357_v34 }
0x2a3e   :  { %2358 = vrcp.f32 %v1864_v35 }
0x2a48   :  { %v2359_v37 = vpop.eup %2358 }
0x2a49   :  { %v1871_v40 = vmul.f32 %v2359_v37, %v1869_v9 }
0x2aac   :  { %v1874_v38 = vpop.permute.xlu0 %1873 }
0x2aad   :  { %v1876_v39 = vmul.f32 %v2359_v37, %v1874_v38 }
0x2aaf   :  { %1878 = vrot.lane.b32.xlu1 %v1876_v39, %s2389_s3 }
0x2ab3   :  { %350 = vrot.lane.b32.xlu1 %v2503_v50, %s2391_s10 }
0x2ab7   :  { %574 = vrot.lane.b32.xlu1 %v2531_v31, %s2391_s10 }
0x2abb   :  { %902 = vrot.lane.b32.xlu1 %v2571_v33, %s2391_s10 }
0x2abf   :  { %1229 = vrot.lane.b32.xlu1 %v2611_v36, %s2391_s10 }
0x2ac3   :  { %1451 = vrot.lane.b32.xlu1 %v2639_v20, %s2391_s10 }
0x2ac7   :  { %1778 = vrot.lane.b32.xlu1 %v1776_v24, %s2391_s10 }
0x2b21   :  { %v1879_v41 = vpop.permute.xlu1 %1878 }
0x2b22   :  { %v1881_v42 = vadd.f32 %v1879_v41, %v1871_v40 }
0x2b24   :  { %2360 = vtanh.f32 %v1881_v42 }
0x2b25   :  { %v351_v50 = vpop.permute.xlu1 %350 }
0x2b26   :  { %354 = vst.msk [vmem:[#allocation2] sm:$0xc] %vm353_vm4, %v351_v50 }
0x2b29   :  { %v575_v31 = vpop.permute.xlu1 %574 }
0x2b2a   :  { %578 = vst.msk [vmem:[#allocation2] sm:$0xc0] %vm577_vm5, %v575_v31 }
0x2b2d   :  { %v903_v33 = vpop.permute.xlu1 %902 }
0x2b2e   :  { %v2361_v36 = vpop.eup %2360  ;;  %905 = vst.msk [vmem:[#allocation2 + $0x8] sm:$0x30] %vm465_vm6, %v903_v33 }
0x2b2f   :  { %1884 = vrot.lane.b32.xlu0 %v2361_v36, %s2390_s9 }
0x2b31   :  { %v1230_v20 = vpop.permute.xlu1 %1229 }
0x2b32   :  { %1232 = vst.msk [vmem:[#allocation2 + $0x10] sm:$0xc] %vm353_vm4, %v1230_v20 }
0x2b33   :  { %462 = vrot.lane.b32.xlu0 %v2517_v8, %s2391_s10 }
0x2b35   :  { %v1452_v44 = vpop.permute.xlu1 %1451 }
0x2b36   :  { %1454 = vst.msk [vmem:[#allocation2 + $0x10] sm:$0xc0] %vm577_vm5, %v1452_v44 }
0x2b37   :  { %791 = vrot.lane.b32.xlu0 %v2557_v10, %s2391_s10 }
0x2b39   :  { %v1779_v45 = vpop.permute.xlu1 %1778 }
0x2b3a   :  { %1781 = vst.msk [vmem:[#allocation2 + $0x18] sm:$0x30] %vm465_vm6, %v1779_v45 }
0x2b3b   :  { %1013 = vrot.lane.b32.xlu0 %v2585_v53, %s2391_s10 }
0x2b3f   :  { %1340 = vrot.lane.b32.xlu0 %v2625_v57, %s2391_s10 }
0x2b43   :  { %1667 = vrot.lane.b32.xlu0 %v2663_v60, %s2391_s10 }
0x2ba1   :  { %v1885_v8 = vpop.permute.xlu0 %1884 }
0x2ba2   :  { %v1887_v46 = vmul.f32 %v2359_v37, %v1885_v8 }
0x2ba4   :  { %1889 = vrot.lane.b32.xlu0 %v1887_v46, %s2391_s10 }
0x2ba5   :  { %v463_v47 = vpop.permute.xlu0 %462 }
0x2ba6   :  { %466 = vst.msk [vmem:[#allocation2] sm:$0x30] %vm465_vm6, %v463_v47 }
0x2ba9   :  { %v792_v10 = vpop.permute.xlu0 %791 }
0x2baa   :  { %794 = vst.msk [vmem:[#allocation2 + $0x8] sm:$0xc] %vm353_vm4, %v792_v10 }
0x2bad   :  { %v1014_v48 = vpop.permute.xlu0 %1013  ;;  %v1893_v49 = vld [vmem:[#allocation2] sm:$0xff] }
0x2bae   :  { %1016 = vst.msk [vmem:[#allocation2 + $0x8] sm:$0xc0] %vm577_vm5, %v1014_v48  ;;  %2217 = vmatprep.mubr.msk.f32.mxu0 %vm36_vm1, %v1893_v49 }
0x2bb1   :  { %v1341_v53 = vpop.permute.xlu0 %1340 }
0x2bb2   :  { %1343 = vst.msk [vmem:[#allocation2 + $0x10] sm:$0x30] %vm465_vm6, %v1341_v53 }
0x2bb5   :  { %v1668_v57 = vpop.permute.xlu0 %1667  ;;  %v1894_v51 = vld [vmem:[#allocation2 + $0x8] sm:$0xff] }
0x2bb6   :  { %1670 = vst.msk [vmem:[#allocation2 + $0x18] sm:$0xc] %vm353_vm4, %v1668_v57  ;;  %2218 = vmatmul.mubr.msk.f32.vlgmr.msra.gmra.mrb[16].mxu0 %vm36_vm1, %v1894_v51 }
0x2bb9   :  { %v1895_v12 = vld [vmem:[#allocation2 + $0x10] sm:$0xff] }
0x2bba   :  { %2220 = vmatprep.mubr.msk.f32.mxu0 %vm36_vm1, %v1895_v12 }
0x2c16   :  { %v1890_v52 = vpop.permute.xlu0 %1889 }
0x2c17   :  { %1892 = vst.msk [vmem:[#allocation2 + $0x18] sm:$0xc0] %vm577_vm5, %v1890_v52 }
0x2c1e   :  { %v1896_v5 = vld [vmem:[#allocation2 + $0x18] sm:$0xff] }
0x2c1f   :  { %2221 = vmatmul.mubr.msk.f32.gmra.mrb[18].mxu0 %vm36_vm1, %v1896_v5 }
0x2c89   :  { %v2219_v54 = vpop.f32.mrb[16].mxu0 }
0x2c8a   :  { %v1992_v55 = vadd.f32 %v2219_v54, %v2079_v6  ;;  %v1986_v56 = vpop.f32.mrb[17].mxu0 }
0x2c8b   :  { %v1987_v58 = vadd.f32 %v2079_v6, %v1986_v56 }
0x2c8c   :  { %2007 = vst.msk [vmem:[#allocation3 + $0x8] sm:$0xff] %vm2005_vm7, %v1992_v55 }
0x2c8d   :  { %2006 = vst.msk [vmem:[#allocation3] sm:$0xff] %vm2005_vm7, %v1987_v58 }
0x2cf2   :  { %v2222_v59 = vpop.f32.mrb[18].mxu0 }
0x2cf3   :  { %v2002_v60 = vadd.f32 %v2222_v59, %v2079_v6  ;;  %v1996_v61 = vpop.f32.mrb[19].mxu0 }
0x2cf4   :  { %v1997_v62 = vadd.f32 %v2079_v6, %v1996_v61 }
0x2cf5   :  { %2009 = vst.msk [vmem:[#allocation3 + $0x18] sm:$0xff] %vm2005_vm7, %v2002_v60 }
0x2cf6   :  { %2008 = vst.msk [vmem:[#allocation3 + $0x10] sm:$0xff] %vm2005_vm7, %v1997_v62 }
0x2cf7   :  { %2373 = shalt.err (!%p2370_p4)
}
0x2cf8   :  { %s2374_s18 = scalar_lea.hbm %s2742_s6, 512 }
0x2cf9   :  { %p2375_p5 = scmp.ne.s32.totalorder %s2742_s6, %s2374_s18  ;;  %p2378_p6 = scmp.lt.u32.totalorder %s2374_s18, %s2742_s6 }
0x2cfb   :  { %p2380_p7 = pnand %p2378_p6, %p2375_p5 }
0x2cfd   :  { %2383 = shalt.err (!%p2380_p7)
}
0x2cfe   :  { %s2393_s23 = smov 128   ;;  %s2394_s24 = smov 8  }
0x2cff   :  { %2021 = dma.vmem_to_hbm [thread:$0]  %s2016_s15, 512, %s2742_s6, [#allocation4], %s2393_s23, %s2393_s23, %s2394_s24  }
0x2d00   :  { %2384 = dma.done.wait [#allocation4], 512  }
0x2d01   :  { %2385 = vsyncadd [#allocation4], 4294966784 }
0x2d02   :  { %2025 = vsyncpa [#allocation4], 1 }

</bundles_post_ra>
